<compile_context>
chip_gen: v7x
topology: tpu7x:2x2x1
jax: 0.10.0
libtpu: 0.0.40
codegen_flags: <defaults>
</compile_context>

<pallas_src>
import functools
import math

import jax
import jax.numpy as jnp
from jax.experimental import pallas as pl
from jax.experimental.pallas import tpu as pltpu

# ----------------------------- config (small) -------------------------------
HIDDEN = 32        # backbone hidden size
N_HEADS = 4
HEAD_DIM = HIDDEN // N_HEADS
FFN = 4 * HIDDEN
N_LAYERS = 2
VOCAB = 50
MAX_LEN = 100      # max_length
NUM_CLASSES = 3
LN_EPS = 1e-5
NEG_INF = -1e30

_VMEM = pl.BlockSpec(memory_space=pltpu.MemorySpace.VMEM)


# ------------------------------ in-kernel math --------------------------------
def _gelu(x):
    # tanh-approximate GELU (see TODO above).
    return 0.5 * x * (1.0 + jnp.tanh(0.7978845608028654 * (x + 0.044715 * x * x * x)))


def _ln(h, g, b):
    mu = jnp.mean(h, axis=-1, keepdims=True)
    d = h - mu
    var = jnp.mean(d * d, axis=-1, keepdims=True)
    return d * jax.lax.rsqrt(var + LN_EPS) * g + b


# ------------------------------- fused kernel ---------------------------------
def _fused_forward_kernel(*refs, B, S, compute_loss):
    BS = B * S
    scale = 1.0 / math.sqrt(HEAD_DIM)

    # -------- unpack refs (inputs..., outputs...) --------
    idx = 0
    ids_ref = refs[idx]; idx += 1            # [BS, 1] int32 token ids
    bias_ref = refs[idx]; idx += 1           # [BS, BS] f32 block-diag attention bias
    if compute_loss:
        labels_ref = refs[idx]; idx += 1     # [B, 1] int32
    word_ref, pos_ref, eg_ref, ebeta_ref = refs[idx:idx + 4]; idx += 4
    layer_refs = []
    for _ in range(N_LAYERS):
        layer_refs.append(refs[idx:idx + 12]); idx += 12
    cw1_ref, cb1_ref, cg_ref, cbeta_ref, cw2_ref, cb2_ref = refs[idx:idx + 6]; idx += 6
    logits_ref = refs[idx]; idx += 1
    if compute_loss:
        loss_ref = refs[idx]; idx += 1

    # -------- embedding: one-hot gather (MXU) + positional add + LayerNorm --------
    ids = ids_ref[...]                                               # [BS, 1] i32
    vocab_iota = jax.lax.broadcasted_iota(jnp.int32, (BS, VOCAB), 1)
    onehot = jnp.where(vocab_iota == ids, 1.0, 0.0)                  # [BS, VOCAB]
    tok = jnp.dot(onehot, word_ref[...], preferred_element_type=jnp.float32)
    pos = pos_ref[0:S, :]                                            # [S, H]
    pos_b = jnp.concatenate([pos] * B, axis=0)                       # [BS, H]
    x = _ln(tok + pos_b, eg_ref[...], ebeta_ref[...])

    attn_bias = bias_ref[...]                                        # [BS, BS]

    # -------- encoder layers (post-LN, BERT/RoBERTa style) --------
    for lr in layer_refs:
        (wqkv, bqkv, wo, bo, g1, bt1, w1, b1, w2, b2, g2, bt2) = lr
        qkv = jnp.dot(x, wqkv[...], preferred_element_type=jnp.float32) + bqkv[...]
        heads = []
        for h in range(N_HEADS):
            lo = h * HEAD_DIM
            qh = qkv[:, lo:lo + HEAD_DIM]
            kh = qkv[:, HIDDEN + lo:HIDDEN + lo + HEAD_DIM]
            vh = qkv[:, 2 * HIDDEN + lo:2 * HIDDEN + lo + HEAD_DIM]
            s = jax.lax.dot_general(qh, kh, (((1,), (1,)), ((), ())),
                                    preferred_element_type=jnp.float32) * scale
            s = s + attn_bias                                        # keep attention batch-local
            m = jnp.max(s, axis=-1, keepdims=True)
            p = jnp.exp(s - m)
            p = p * pl.reciprocal(jnp.sum(p, axis=-1, keepdims=True), approx=True)
            heads.append(jnp.dot(p, vh, preferred_element_type=jnp.float32))
        attn = jnp.concatenate(heads, axis=-1)                       # [BS, H]
        attn = jnp.dot(attn, wo[...], preferred_element_type=jnp.float32) + bo[...]
        x = _ln(x + attn, g1[...], bt1[...])
        ff = _gelu(jnp.dot(x, w1[...], preferred_element_type=jnp.float32) + b1[...])
        ff = jnp.dot(ff, w2[...], preferred_element_type=jnp.float32) + b2[...]
        x = _ln(x + ff, g2[...], bt2[...])

    # -------- CLS pooling + classifier head --------
    feat = jnp.concatenate([x[b * S:b * S + 1, :] for b in range(B)], axis=0)  # [B, H]
    h1 = jnp.dot(feat, cw1_ref[...], preferred_element_type=jnp.float32) + cb1_ref[...]
    hg = _gelu(_ln(h1, cg_ref[...], cbeta_ref[...]))
    logits = jnp.dot(hg, cw2_ref[...], preferred_element_type=jnp.float32) + cb2_ref[...]
    logits_ref[...] = logits

    # -------- mean cross-entropy (integer labels) --------
    if compute_loss:
        labels = labels_ref[...]                                     # [B, 1] i32
        m = jnp.max(logits, axis=-1, keepdims=True)
        z = logits - m
        lse = jnp.log(jnp.sum(jnp.exp(z), axis=-1, keepdims=True))
        cls_ids = jax.lax.broadcasted_iota(jnp.int32, logits.shape, 1)
        picked = jnp.sum(jnp.where(cls_ids == labels, z, 0.0), axis=-1, keepdims=True)
        per = lse - picked                                           # [B, 1]
        loss_ref[...] = jnp.sum(per, axis=0, keepdims=True) * (1.0 / B)


# ------------------------------- model wrapper --------------------------------
def _flatten_params(p):
    flat = [p['word_emb'], p['pos_emb'],
            p['emb_ln_g'].reshape(1, -1), p['emb_ln_b'].reshape(1, -1)]
    for lp in p['layers']:
        flat += [lp['w_qkv'], lp['b_qkv'].reshape(1, -1),
                 lp['wo'], lp['bo'].reshape(1, -1),
                 lp['ln1_g'].reshape(1, -1), lp['ln1_b'].reshape(1, -1),
                 lp['w1'], lp['b1'].reshape(1, -1),
                 lp['w2'], lp['b2'].reshape(1, -1),
                 lp['ln2_g'].reshape(1, -1), lp['ln2_b'].reshape(1, -1)]
    flat += [p['cls_w1'], p['cls_b1'].reshape(1, -1),
             p['cls_ln_g'].reshape(1, -1), p['cls_ln_b'].reshape(1, -1),
             p['cls_w2'], p['cls_b2'].reshape(1, -1)]
    return flat


def model_forward(params, token_ids, labels=None):
    B, S = token_ids.shape
    BS = B * S
    compute_loss = labels is not None

    ids = token_ids.reshape(BS, 1).astype(jnp.int32)
    # Block-diagonal additive attention bias (0 within a sequence, -inf across
    # sequences); compile-time constant under jit, avoids any in-kernel int div.
    row_b = jnp.arange(BS, dtype=jnp.int32)[:, None] // S
    col_b = jnp.arange(BS, dtype=jnp.int32)[None, :] // S
    attn_bias = jnp.where(row_b == col_b, 0.0, NEG_INF).astype(jnp.float32)

    inputs = [ids, attn_bias]
    if compute_loss:
        inputs.append(labels.reshape(B, 1).astype(jnp.int32))
    inputs += _flatten_params(params)

    kern = functools.partial(_fused_forward_kernel, B=B, S=S, compute_loss=compute_loss)

    if compute_loss:
        out_shape = (jax.ShapeDtypeStruct((B, NUM_CLASSES), jnp.float32),
                     jax.ShapeDtypeStruct((1, 1), jnp.float32))
        out_specs = (_VMEM, _VMEM)
    else:
        out_shape = jax.ShapeDtypeStruct((B, NUM_CLASSES), jnp.float32)
        out_specs = _VMEM

    outs = pl.pallas_call(
        kern,
        out_shape=out_shape,
        in_specs=[_VMEM] * len(inputs),
        out_specs=out_specs,
    )(*inputs)

    if compute_loss:
        logits, loss = outs
        return {'logits': logits, 'losses': {'ce_loss': loss[0, 0]}}
    return {'logits': outs}


# ------------------------------ parameter init --------------------------------
def init_params(key):
    it = iter(jax.random.split(key, 256))

    def W(*shape):   # weights: normal(0, 0.02)  (matches init_weights)
        return jax.random.normal(next(it), shape, jnp.float32) * 0.02

    def Z(*shape):   # biases: 0
        return jnp.zeros(shape, jnp.float32)

    layers = []
    for _ in range(N_LAYERS):
        layers.append(dict(
            # [in_features, out_features] layout, Q/K/V fused along out dim.
            w_qkv=W(HIDDEN, 3 * HIDDEN), b_qkv=Z(3 * HIDDEN),
            wo=W(HIDDEN, HIDDEN), bo=Z(HIDDEN),
            ln1_g=W(HIDDEN), ln1_b=Z(HIDDEN),
            w1=W(HIDDEN, FFN), b1=Z(FFN),
            w2=W(FFN, HIDDEN), b2=Z(HIDDEN),
            ln2_g=W(HIDDEN), ln2_b=Z(HIDDEN),
        ))
    return dict(
        word_emb=W(VOCAB, HIDDEN),
        pos_emb=W(MAX_LEN, HIDDEN),
        emb_ln_g=W(HIDDEN), emb_ln_b=Z(HIDDEN),
        layers=layers,
        cls_w1=W(HIDDEN, HIDDEN), cls_b1=Z(HIDDEN),
        cls_ln_g=W(HIDDEN), cls_ln_b=Z(HIDDEN),
        cls_w2=W(HIDDEN, NUM_CLASSES), cls_b2=Z(NUM_CLASSES),
    )


# ---------------------------------- main --------------------------------------
if __name__ == "__main__":
    key = jax.random.PRNGKey(0)
    k_param, k_tok, k_lab = jax.random.split(key, 3)

    params = init_params(k_param)

    B, S = 2, 8
    token_ids = jax.random.randint(k_tok, (B, S), 0, VOCAB, dtype=jnp.int32)
    labels = jax.random.randint(k_lab, (B,), 0, NUM_CLASSES, dtype=jnp.int32)

    fwd = jax.jit(model_forward)
    out = fwd(params, token_ids, labels)
    jax.block_until_ready(out)

    assert out['logits'].shape == (B, NUM_CLASSES)
    assert out['losses']['ce_loss'].shape == ()
    print("KERNEL_OK")
</pallas_src>

<mosaic_0001>
module attributes {stable_mosaic.version = 11 : i64} {
  func.func @_fused_forward_kernel(%arg0: memref<16x1xi32, #tpu.memory_space<vmem>>, %arg1: memref<16x16xf32, #tpu.memory_space<vmem>>, %arg2: memref<2x1xi32, #tpu.memory_space<vmem>>, %arg3: memref<50x32xf32, #tpu.memory_space<vmem>>, %arg4: memref<100x32xf32, #tpu.memory_space<vmem>>, %arg5: memref<1x32xf32, #tpu.memory_space<vmem>>, %arg6: memref<1x32xf32, #tpu.memory_space<vmem>>, %arg7: memref<32x96xf32, #tpu.memory_space<vmem>>, %arg8: memref<1x96xf32, #tpu.memory_space<vmem>>, %arg9: memref<32x32xf32, #tpu.memory_space<vmem>>, %arg10: memref<1x32xf32, #tpu.memory_space<vmem>>, %arg11: memref<1x32xf32, #tpu.memory_space<vmem>>, %arg12: memref<1x32xf32, #tpu.memory_space<vmem>>, %arg13: memref<32x128xf32, #tpu.memory_space<vmem>>, %arg14: memref<1x128xf32, #tpu.memory_space<vmem>>, %arg15: memref<128x32xf32, #tpu.memory_space<vmem>>, %arg16: memref<1x32xf32, #tpu.memory_space<vmem>>, %arg17: memref<1x32xf32, #tpu.memory_space<vmem>>, %arg18: memref<1x32xf32, #tpu.memory_space<vmem>>, %arg19: memref<32x96xf32, #tpu.memory_space<vmem>>, %arg20: memref<1x96xf32, #tpu.memory_space<vmem>>, %arg21: memref<32x32xf32, #tpu.memory_space<vmem>>, %arg22: memref<1x32xf32, #tpu.memory_space<vmem>>, %arg23: memref<1x32xf32, #tpu.memory_space<vmem>>, %arg24: memref<1x32xf32, #tpu.memory_space<vmem>>, %arg25: memref<32x128xf32, #tpu.memory_space<vmem>>, %arg26: memref<1x128xf32, #tpu.memory_space<vmem>>, %arg27: memref<128x32xf32, #tpu.memory_space<vmem>>, %arg28: memref<1x32xf32, #tpu.memory_space<vmem>>, %arg29: memref<1x32xf32, #tpu.memory_space<vmem>>, %arg30: memref<1x32xf32, #tpu.memory_space<vmem>>, %arg31: memref<32x32xf32, #tpu.memory_space<vmem>>, %arg32: memref<1x32xf32, #tpu.memory_space<vmem>>, %arg33: memref<1x32xf32, #tpu.memory_space<vmem>>, %arg34: memref<1x32xf32, #tpu.memory_space<vmem>>, %arg35: memref<32x3xf32, #tpu.memory_space<vmem>>, %arg36: memref<1x3xf32, #tpu.memory_space<vmem>>, %arg37: memref<2x3xf32, #tpu.memory_space<vmem>>, %arg38: memref<1x1xf32, #tpu.memory_space<vmem>>) attributes {dimension_semantics = [], scalar_prefetch = 0 : i64, scratch_operands = 0 : i64, tpu.core_type = #tpu.core_type<tc>} {
    %c0 = arith.constant 0 : index
    %c0_0 = arith.constant 0 : index
    %0 = vector.load %arg0[%c0, %c0_0] : memref<16x1xi32, #tpu.memory_space<vmem>>, vector<16x1xi32>
    %1 = tpu.iota {dimensions = array<i32: 1>} : vector<16x50xi32>
    %2 = vector.broadcast %0 : vector<16x1xi32> to vector<16x50xi32>
    %3 = arith.cmpi eq, %1, %2 : vector<16x50xi32>
    %cst = arith.constant 1.000000e+00 : f32
    %cst_1 = arith.constant 0.000000e+00 : f32
    %4 = vector.broadcast %cst : f32 to vector<16x50xf32>
    %5 = vector.broadcast %cst_1 : f32 to vector<16x50xf32>
    %6 = arith.select %3, %4, %5 : vector<16x50xi1>, vector<16x50xf32>
    %c0_2 = arith.constant 0 : index
    %c0_3 = arith.constant 0 : index
    %7 = vector.load %arg3[%c0_2, %c0_3] : memref<50x32xf32, #tpu.memory_space<vmem>>, vector<50x32xf32>
    %cst_4 = arith.constant dense<0.000000e+00> : vector<16x32xf32>
    %8 = tpu.matmul %6, %7, %cst_4 {dimension_numbers = #tpu.dot_dimension_numbers<[1], [0], [0], [1], [0, 0, 1, 1], [], []>} : vector<16x50xf32>, vector<50x32xf32>, vector<16x32xf32> -> vector<16x32xf32>
    %c0_5 = arith.constant 0 : index
    %c0_6 = arith.constant 0 : index
    %9 = vector.load %arg4[%c0_5, %c0_6] : memref<100x32xf32, #tpu.memory_space<vmem>>, vector<8x32xf32>
    %10 = tpu.concatenate %9, %9 in 0 : vector<8x32xf32>, vector<8x32xf32> -> vector<16x32xf32>
    %11 = arith.addf %8, %10 : vector<16x32xf32>
    %c0_7 = arith.constant 0 : index
    %c0_8 = arith.constant 0 : index
    %12 = vector.load %arg5[%c0_7, %c0_8] : memref<1x32xf32, #tpu.memory_space<vmem>>, vector<1x32xf32>
    %c0_9 = arith.constant 0 : index
    %c0_10 = arith.constant 0 : index
    %13 = vector.load %arg6[%c0_9, %c0_10] : memref<1x32xf32, #tpu.memory_space<vmem>>, vector<1x32xf32>
    %cst_11 = arith.constant dense<0.000000e+00> : vector<16xf32>
    %14 = vector.multi_reduction <add>, %11, %cst_11 [1] : vector<16x32xf32> to vector<16xf32>
    %15 = vector.shape_cast %14 : vector<16xf32> to vector<16x1xf32>
    %cst_12 = arith.constant 3.200000e+01 : f32
    %16 = vector.broadcast %cst_12 : f32 to vector<16x1xf32>
    %17 = arith.divf %15, %16 : vector<16x1xf32>
    %18 = vector.broadcast %17 : vector<16x1xf32> to vector<16x32xf32>
    %19 = arith.subf %11, %18 : vector<16x32xf32>
    %20 = arith.mulf %19, %19 : vector<16x32xf32>
    %cst_13 = arith.constant dense<0.000000e+00> : vector<16xf32>
    %21 = vector.multi_reduction <add>, %20, %cst_13 [1] : vector<16x32xf32> to vector<16xf32>
    %22 = vector.shape_cast %21 : vector<16xf32> to vector<16x1xf32>
    %cst_14 = arith.constant 3.200000e+01 : f32
    %23 = vector.broadcast %cst_14 : f32 to vector<16x1xf32>
    %24 = arith.divf %22, %23 : vector<16x1xf32>
    %cst_15 = arith.constant 9.99999974E-6 : f32
    %25 = vector.broadcast %cst_15 : f32 to vector<16x1xf32>
    %26 = arith.addf %24, %25 : vector<16x1xf32>
    %27 = math.rsqrt %26 : vector<16x1xf32>
    %28 = vector.broadcast %27 : vector<16x1xf32> to vector<16x32xf32>
    %29 = arith.mulf %19, %28 : vector<16x32xf32>
    %30 = vector.broadcast %12 : vector<1x32xf32> to vector<16x32xf32>
    %31 = arith.mulf %29, %30 : vector<16x32xf32>
    %32 = vector.broadcast %13 : vector<1x32xf32> to vector<16x32xf32>
    %33 = arith.addf %31, %32 : vector<16x32xf32>
    %c0_16 = arith.constant 0 : index
    %c0_17 = arith.constant 0 : index
    %34 = vector.load %arg1[%c0_16, %c0_17] : memref<16x16xf32, #tpu.memory_space<vmem>>, vector<16x16xf32>
    %c0_18 = arith.constant 0 : index
    %c0_19 = arith.constant 0 : index
    %35 = vector.load %arg7[%c0_18, %c0_19] : memref<32x96xf32, #tpu.memory_space<vmem>>, vector<32x96xf32>
    %cst_20 = arith.constant dense<0.000000e+00> : vector<16x96xf32>
    %36 = tpu.matmul %33, %35, %cst_20 {dimension_numbers = #tpu.dot_dimension_numbers<[1], [0], [0], [1], [0, 0, 1, 1], [], []>} : vector<16x32xf32>, vector<32x96xf32>, vector<16x96xf32> -> vector<16x96xf32>
    %c0_21 = arith.constant 0 : index
    %c0_22 = arith.constant 0 : index
    %37 = vector.load %arg8[%c0_21, %c0_22] : memref<1x96xf32, #tpu.memory_space<vmem>>, vector<1x96xf32>
    %38 = vector.broadcast %37 : vector<1x96xf32> to vector<16x96xf32>
    %39 = arith.addf %36, %38 : vector<16x96xf32>
    %40 = vector.extract_strided_slice %39 {offsets = [0, 0], sizes = [16, 8], strides = [1, 1]} : vector<16x96xf32> to vector<16x8xf32>
    %41 = vector.extract_strided_slice %39 {offsets = [0, 32], sizes = [16, 8], strides = [1, 1]} : vector<16x96xf32> to vector<16x8xf32>
    %42 = vector.extract_strided_slice %39 {offsets = [0, 64], sizes = [16, 8], strides = [1, 1]} : vector<16x96xf32> to vector<16x8xf32>
    %cst_23 = arith.constant dense<0.000000e+00> : vector<16x16xf32>
    %43 = tpu.matmul %40, %41, %cst_23 {dimension_numbers = #tpu.dot_dimension_numbers<[1], [1], [0], [0], [0, 0, 1, 0], [], []>} : vector<16x8xf32>, vector<16x8xf32>, vector<16x16xf32> -> vector<16x16xf32>
    %cst_24 = arith.constant 0.353553385 : f32
    %44 = vector.broadcast %cst_24 : f32 to vector<16x16xf32>
    %45 = arith.mulf %43, %44 : vector<16x16xf32>
    %46 = arith.addf %45, %34 : vector<16x16xf32>
    %cst_25 = arith.constant dense<0xFF800000> : vector<16xf32>
    %47 = vector.multi_reduction <maximumf>, %46, %cst_25 [1] : vector<16x16xf32> to vector<16xf32>
    %48 = vector.shape_cast %47 : vector<16xf32> to vector<16x1xf32>
    %49 = vector.broadcast %48 : vector<16x1xf32> to vector<16x16xf32>
    %50 = arith.subf %46, %49 : vector<16x16xf32>
    %51 = math.exp %50 : vector<16x16xf32>
    %cst_26 = arith.constant dense<0.000000e+00> : vector<16xf32>
    %52 = vector.multi_reduction <add>, %51, %cst_26 [1] : vector<16x16xf32> to vector<16xf32>
    %53 = vector.shape_cast %52 : vector<16xf32> to vector<16x1xf32>
    %54 = tpu.reciprocal %53 {approx = true} : vector<16x1xf32> -> vector<16x1xf32>
    %55 = vector.broadcast %54 : vector<16x1xf32> to vector<16x16xf32>
    %56 = arith.mulf %51, %55 : vector<16x16xf32>
    %cst_27 = arith.constant dense<0.000000e+00> : vector<16x8xf32>
    %57 = tpu.matmul %56, %42, %cst_27 {dimension_numbers = #tpu.dot_dimension_numbers<[1], [0], [0], [1], [0, 0, 1, 1], [], []>} : vector<16x16xf32>, vector<16x8xf32>, vector<16x8xf32> -> vector<16x8xf32>
    %58 = vector.extract_strided_slice %39 {offsets = [0, 8], sizes = [16, 8], strides = [1, 1]} : vector<16x96xf32> to vector<16x8xf32>
    %59 = vector.extract_strided_slice %39 {offsets = [0, 40], sizes = [16, 8], strides = [1, 1]} : vector<16x96xf32> to vector<16x8xf32>
    %60 = vector.extract_strided_slice %39 {offsets = [0, 72], sizes = [16, 8], strides = [1, 1]} : vector<16x96xf32> to vector<16x8xf32>
    %cst_28 = arith.constant dense<0.000000e+00> : vector<16x16xf32>
    %61 = tpu.matmul %58, %59, %cst_28 {dimension_numbers = #tpu.dot_dimension_numbers<[1], [1], [0], [0], [0, 0, 1, 0], [], []>} : vector<16x8xf32>, vector<16x8xf32>, vector<16x16xf32> -> vector<16x16xf32>
    %cst_29 = arith.constant 0.353553385 : f32
    %62 = vector.broadcast %cst_29 : f32 to vector<16x16xf32>
    %63 = arith.mulf %61, %62 : vector<16x16xf32>
    %64 = arith.addf %63, %34 : vector<16x16xf32>
    %cst_30 = arith.constant dense<0xFF800000> : vector<16xf32>
    %65 = vector.multi_reduction <maximumf>, %64, %cst_30 [1] : vector<16x16xf32> to vector<16xf32>
    %66 = vector.shape_cast %65 : vector<16xf32> to vector<16x1xf32>
    %67 = vector.broadcast %66 : vector<16x1xf32> to vector<16x16xf32>
    %68 = arith.subf %64, %67 : vector<16x16xf32>
    %69 = math.exp %68 : vector<16x16xf32>
    %cst_31 = arith.constant dense<0.000000e+00> : vector<16xf32>
    %70 = vector.multi_reduction <add>, %69, %cst_31 [1] : vector<16x16xf32> to vector<16xf32>
    %71 = vector.shape_cast %70 : vector<16xf32> to vector<16x1xf32>
    %72 = tpu.reciprocal %71 {approx = true} : vector<16x1xf32> -> vector<16x1xf32>
    %73 = vector.broadcast %72 : vector<16x1xf32> to vector<16x16xf32>
    %74 = arith.mulf %69, %73 : vector<16x16xf32>
    %cst_32 = arith.constant dense<0.000000e+00> : vector<16x8xf32>
    %75 = tpu.matmul %74, %60, %cst_32 {dimension_numbers = #tpu.dot_dimension_numbers<[1], [0], [0], [1], [0, 0, 1, 1], [], []>} : vector<16x16xf32>, vector<16x8xf32>, vector<16x8xf32> -> vector<16x8xf32>
    %76 = vector.extract_strided_slice %39 {offsets = [0, 16], sizes = [16, 8], strides = [1, 1]} : vector<16x96xf32> to vector<16x8xf32>
    %77 = vector.extract_strided_slice %39 {offsets = [0, 48], sizes = [16, 8], strides = [1, 1]} : vector<16x96xf32> to vector<16x8xf32>
    %78 = vector.extract_strided_slice %39 {offsets = [0, 80], sizes = [16, 8], strides = [1, 1]} : vector<16x96xf32> to vector<16x8xf32>
    %cst_33 = arith.constant dense<0.000000e+00> : vector<16x16xf32>
    %79 = tpu.matmul %76, %77, %cst_33 {dimension_numbers = #tpu.dot_dimension_numbers<[1], [1], [0], [0], [0, 0, 1, 0], [], []>} : vector<16x8xf32>, vector<16x8xf32>, vector<16x16xf32> -> vector<16x16xf32>
    %cst_34 = arith.constant 0.353553385 : f32
    %80 = vector.broadcast %cst_34 : f32 to vector<16x16xf32>
    %81 = arith.mulf %79, %80 : vector<16x16xf32>
    %82 = arith.addf %81, %34 : vector<16x16xf32>
    %cst_35 = arith.constant dense<0xFF800000> : vector<16xf32>
    %83 = vector.multi_reduction <maximumf>, %82, %cst_35 [1] : vector<16x16xf32> to vector<16xf32>
    %84 = vector.shape_cast %83 : vector<16xf32> to vector<16x1xf32>
    %85 = vector.broadcast %84 : vector<16x1xf32> to vector<16x16xf32>
    %86 = arith.subf %82, %85 : vector<16x16xf32>
    %87 = math.exp %86 : vector<16x16xf32>
    %cst_36 = arith.constant dense<0.000000e+00> : vector<16xf32>
    %88 = vector.multi_reduction <add>, %87, %cst_36 [1] : vector<16x16xf32> to vector<16xf32>
    %89 = vector.shape_cast %88 : vector<16xf32> to vector<16x1xf32>
    %90 = tpu.reciprocal %89 {approx = true} : vector<16x1xf32> -> vector<16x1xf32>
    %91 = vector.broadcast %90 : vector<16x1xf32> to vector<16x16xf32>
    %92 = arith.mulf %87, %91 : vector<16x16xf32>
    %cst_37 = arith.constant dense<0.000000e+00> : vector<16x8xf32>
    %93 = tpu.matmul %92, %78, %cst_37 {dimension_numbers = #tpu.dot_dimension_numbers<[1], [0], [0], [1], [0, 0, 1, 1], [], []>} : vector<16x16xf32>, vector<16x8xf32>, vector<16x8xf32> -> vector<16x8xf32>
    %94 = vector.extract_strided_slice %39 {offsets = [0, 24], sizes = [16, 8], strides = [1, 1]} : vector<16x96xf32> to vector<16x8xf32>
    %95 = vector.extract_strided_slice %39 {offsets = [0, 56], sizes = [16, 8], strides = [1, 1]} : vector<16x96xf32> to vector<16x8xf32>
    %96 = vector.extract_strided_slice %39 {offsets = [0, 88], sizes = [16, 8], strides = [1, 1]} : vector<16x96xf32> to vector<16x8xf32>
    %cst_38 = arith.constant dense<0.000000e+00> : vector<16x16xf32>
    %97 = tpu.matmul %94, %95, %cst_38 {dimension_numbers = #tpu.dot_dimension_numbers<[1], [1], [0], [0], [0, 0, 1, 0], [], []>} : vector<16x8xf32>, vector<16x8xf32>, vector<16x16xf32> -> vector<16x16xf32>
    %cst_39 = arith.constant 0.353553385 : f32
    %98 = vector.broadcast %cst_39 : f32 to vector<16x16xf32>
    %99 = arith.mulf %97, %98 : vector<16x16xf32>
    %100 = arith.addf %99, %34 : vector<16x16xf32>
    %cst_40 = arith.constant dense<0xFF800000> : vector<16xf32>
    %101 = vector.multi_reduction <maximumf>, %100, %cst_40 [1] : vector<16x16xf32> to vector<16xf32>
    %102 = vector.shape_cast %101 : vector<16xf32> to vector<16x1xf32>
    %103 = vector.broadcast %102 : vector<16x1xf32> to vector<16x16xf32>
    %104 = arith.subf %100, %103 : vector<16x16xf32>
    %105 = math.exp %104 : vector<16x16xf32>
    %cst_41 = arith.constant dense<0.000000e+00> : vector<16xf32>
    %106 = vector.multi_reduction <add>, %105, %cst_41 [1] : vector<16x16xf32> to vector<16xf32>
    %107 = vector.shape_cast %106 : vector<16xf32> to vector<16x1xf32>
    %108 = tpu.reciprocal %107 {approx = true} : vector<16x1xf32> -> vector<16x1xf32>
    %109 = vector.broadcast %108 : vector<16x1xf32> to vector<16x16xf32>
    %110 = arith.mulf %105, %109 : vector<16x16xf32>
    %cst_42 = arith.constant dense<0.000000e+00> : vector<16x8xf32>
    %111 = tpu.matmul %110, %96, %cst_42 {dimension_numbers = #tpu.dot_dimension_numbers<[1], [0], [0], [1], [0, 0, 1, 1], [], []>} : vector<16x16xf32>, vector<16x8xf32>, vector<16x8xf32> -> vector<16x8xf32>
    %112 = tpu.concatenate %57, %75, %93, %111 in 1 : vector<16x8xf32>, vector<16x8xf32>, vector<16x8xf32>, vector<16x8xf32> -> vector<16x32xf32>
    %c0_43 = arith.constant 0 : index
    %c0_44 = arith.constant 0 : index
    %113 = vector.load %arg9[%c0_43, %c0_44] : memref<32x32xf32, #tpu.memory_space<vmem>>, vector<32x32xf32>
    %cst_45 = arith.constant dense<0.000000e+00> : vector<16x32xf32>
    %114 = tpu.matmul %112, %113, %cst_45 {dimension_numbers = #tpu.dot_dimension_numbers<[1], [0], [0], [1], [0, 0, 1, 1], [], []>} : vector<16x32xf32>, vector<32x32xf32>, vector<16x32xf32> -> vector<16x32xf32>
    %c0_46 = arith.constant 0 : index
    %c0_47 = arith.constant 0 : index
    %115 = vector.load %arg10[%c0_46, %c0_47] : memref<1x32xf32, #tpu.memory_space<vmem>>, vector<1x32xf32>
    %116 = vector.broadcast %115 : vector<1x32xf32> to vector<16x32xf32>
    %117 = arith.addf %114, %116 : vector<16x32xf32>
    %118 = arith.addf %33, %117 : vector<16x32xf32>
    %c0_48 = arith.constant 0 : index
    %c0_49 = arith.constant 0 : index
    %119 = vector.load %arg11[%c0_48, %c0_49] : memref<1x32xf32, #tpu.memory_space<vmem>>, vector<1x32xf32>
    %c0_50 = arith.constant 0 : index
    %c0_51 = arith.constant 0 : index
    %120 = vector.load %arg12[%c0_50, %c0_51] : memref<1x32xf32, #tpu.memory_space<vmem>>, vector<1x32xf32>
    %cst_52 = arith.constant dense<0.000000e+00> : vector<16xf32>
    %121 = vector.multi_reduction <add>, %118, %cst_52 [1] : vector<16x32xf32> to vector<16xf32>
    %122 = vector.shape_cast %121 : vector<16xf32> to vector<16x1xf32>
    %cst_53 = arith.constant 3.200000e+01 : f32
    %123 = vector.broadcast %cst_53 : f32 to vector<16x1xf32>
    %124 = arith.divf %122, %123 : vector<16x1xf32>
    %125 = vector.broadcast %124 : vector<16x1xf32> to vector<16x32xf32>
    %126 = arith.subf %118, %125 : vector<16x32xf32>
    %127 = arith.mulf %126, %126 : vector<16x32xf32>
    %cst_54 = arith.constant dense<0.000000e+00> : vector<16xf32>
    %128 = vector.multi_reduction <add>, %127, %cst_54 [1] : vector<16x32xf32> to vector<16xf32>
    %129 = vector.shape_cast %128 : vector<16xf32> to vector<16x1xf32>
    %cst_55 = arith.constant 3.200000e+01 : f32
    %130 = vector.broadcast %cst_55 : f32 to vector<16x1xf32>
    %131 = arith.divf %129, %130 : vector<16x1xf32>
    %cst_56 = arith.constant 9.99999974E-6 : f32
    %132 = vector.broadcast %cst_56 : f32 to vector<16x1xf32>
    %133 = arith.addf %131, %132 : vector<16x1xf32>
    %134 = math.rsqrt %133 : vector<16x1xf32>
    %135 = vector.broadcast %134 : vector<16x1xf32> to vector<16x32xf32>
    %136 = arith.mulf %126, %135 : vector<16x32xf32>
    %137 = vector.broadcast %119 : vector<1x32xf32> to vector<16x32xf32>
    %138 = arith.mulf %136, %137 : vector<16x32xf32>
    %139 = vector.broadcast %120 : vector<1x32xf32> to vector<16x32xf32>
    %140 = arith.addf %138, %139 : vector<16x32xf32>
    %c0_57 = arith.constant 0 : index
    %c0_58 = arith.constant 0 : index
    %141 = vector.load %arg13[%c0_57, %c0_58] : memref<32x128xf32, #tpu.memory_space<vmem>>, vector<32x128xf32>
    %cst_59 = arith.constant dense<0.000000e+00> : vector<16x128xf32>
    %142 = tpu.matmul %140, %141, %cst_59 {dimension_numbers = #tpu.dot_dimension_numbers<[1], [0], [0], [1], [0, 0, 1, 1], [], []>} : vector<16x32xf32>, vector<32x128xf32>, vector<16x128xf32> -> vector<16x128xf32>
    %c0_60 = arith.constant 0 : index
    %c0_61 = arith.constant 0 : index
    %143 = vector.load %arg14[%c0_60, %c0_61] : memref<1x128xf32, #tpu.memory_space<vmem>>, vector<1x128xf32>
    %144 = vector.broadcast %143 : vector<1x128xf32> to vector<16x128xf32>
    %145 = arith.addf %142, %144 : vector<16x128xf32>
    %cst_62 = arith.constant 5.000000e-01 : f32
    %146 = vector.broadcast %cst_62 : f32 to vector<16x128xf32>
    %147 = arith.mulf %146, %145 : vector<16x128xf32>
    %cst_63 = arith.constant 4.471500e-02 : f32
    %148 = vector.broadcast %cst_63 : f32 to vector<16x128xf32>
    %149 = arith.mulf %148, %145 : vector<16x128xf32>
    %150 = arith.mulf %149, %145 : vector<16x128xf32>
    %151 = arith.mulf %150, %145 : vector<16x128xf32>
    %152 = arith.addf %145, %151 : vector<16x128xf32>
    %cst_64 = arith.constant 0.797884583 : f32
    %153 = vector.broadcast %cst_64 : f32 to vector<16x128xf32>
    %154 = arith.mulf %153, %152 : vector<16x128xf32>
    %155 = math.tanh %154 : vector<16x128xf32>
    %cst_65 = arith.constant 1.000000e+00 : f32
    %156 = vector.broadcast %cst_65 : f32 to vector<16x128xf32>
    %157 = arith.addf %156, %155 : vector<16x128xf32>
    %158 = arith.mulf %147, %157 : vector<16x128xf32>
    %c0_66 = arith.constant 0 : index
    %c0_67 = arith.constant 0 : index
    %159 = vector.load %arg15[%c0_66, %c0_67] : memref<128x32xf32, #tpu.memory_space<vmem>>, vector<128x32xf32>
    %cst_68 = arith.constant dense<0.000000e+00> : vector<16x32xf32>
    %160 = tpu.matmul %158, %159, %cst_68 {dimension_numbers = #tpu.dot_dimension_numbers<[1], [0], [0], [1], [0, 0, 1, 1], [], []>} : vector<16x128xf32>, vector<128x32xf32>, vector<16x32xf32> -> vector<16x32xf32>
    %c0_69 = arith.constant 0 : index
    %c0_70 = arith.constant 0 : index
    %161 = vector.load %arg16[%c0_69, %c0_70] : memref<1x32xf32, #tpu.memory_space<vmem>>, vector<1x32xf32>
    %162 = vector.broadcast %161 : vector<1x32xf32> to vector<16x32xf32>
    %163 = arith.addf %160, %162 : vector<16x32xf32>
    %164 = arith.addf %140, %163 : vector<16x32xf32>
    %c0_71 = arith.constant 0 : index
    %c0_72 = arith.constant 0 : index
    %165 = vector.load %arg17[%c0_71, %c0_72] : memref<1x32xf32, #tpu.memory_space<vmem>>, vector<1x32xf32>
    %c0_73 = arith.constant 0 : index
    %c0_74 = arith.constant 0 : index
    %166 = vector.load %arg18[%c0_73, %c0_74] : memref<1x32xf32, #tpu.memory_space<vmem>>, vector<1x32xf32>
    %cst_75 = arith.constant dense<0.000000e+00> : vector<16xf32>
    %167 = vector.multi_reduction <add>, %164, %cst_75 [1] : vector<16x32xf32> to vector<16xf32>
    %168 = vector.shape_cast %167 : vector<16xf32> to vector<16x1xf32>
    %cst_76 = arith.constant 3.200000e+01 : f32
    %169 = vector.broadcast %cst_76 : f32 to vector<16x1xf32>
    %170 = arith.divf %168, %169 : vector<16x1xf32>
    %171 = vector.broadcast %170 : vector<16x1xf32> to vector<16x32xf32>
    %172 = arith.subf %164, %171 : vector<16x32xf32>
    %173 = arith.mulf %172, %172 : vector<16x32xf32>
    %cst_77 = arith.constant dense<0.000000e+00> : vector<16xf32>
    %174 = vector.multi_reduction <add>, %173, %cst_77 [1] : vector<16x32xf32> to vector<16xf32>
    %175 = vector.shape_cast %174 : vector<16xf32> to vector<16x1xf32>
    %cst_78 = arith.constant 3.200000e+01 : f32
    %176 = vector.broadcast %cst_78 : f32 to vector<16x1xf32>
    %177 = arith.divf %175, %176 : vector<16x1xf32>
    %cst_79 = arith.constant 9.99999974E-6 : f32
    %178 = vector.broadcast %cst_79 : f32 to vector<16x1xf32>
    %179 = arith.addf %177, %178 : vector<16x1xf32>
    %180 = math.rsqrt %179 : vector<16x1xf32>
    %181 = vector.broadcast %180 : vector<16x1xf32> to vector<16x32xf32>
    %182 = arith.mulf %172, %181 : vector<16x32xf32>
    %183 = vector.broadcast %165 : vector<1x32xf32> to vector<16x32xf32>
    %184 = arith.mulf %182, %183 : vector<16x32xf32>
    %185 = vector.broadcast %166 : vector<1x32xf32> to vector<16x32xf32>
    %186 = arith.addf %184, %185 : vector<16x32xf32>
    %c0_80 = arith.constant 0 : index
    %c0_81 = arith.constant 0 : index
    %187 = vector.load %arg19[%c0_80, %c0_81] : memref<32x96xf32, #tpu.memory_space<vmem>>, vector<32x96xf32>
    %cst_82 = arith.constant dense<0.000000e+00> : vector<16x96xf32>
    %188 = tpu.matmul %186, %187, %cst_82 {dimension_numbers = #tpu.dot_dimension_numbers<[1], [0], [0], [1], [0, 0, 1, 1], [], []>} : vector<16x32xf32>, vector<32x96xf32>, vector<16x96xf32> -> vector<16x96xf32>
    %c0_83 = arith.constant 0 : index
    %c0_84 = arith.constant 0 : index
    %189 = vector.load %arg20[%c0_83, %c0_84] : memref<1x96xf32, #tpu.memory_space<vmem>>, vector<1x96xf32>
    %190 = vector.broadcast %189 : vector<1x96xf32> to vector<16x96xf32>
    %191 = arith.addf %188, %190 : vector<16x96xf32>
    %192 = vector.extract_strided_slice %191 {offsets = [0, 0], sizes = [16, 8], strides = [1, 1]} : vector<16x96xf32> to vector<16x8xf32>
    %193 = vector.extract_strided_slice %191 {offsets = [0, 32], sizes = [16, 8], strides = [1, 1]} : vector<16x96xf32> to vector<16x8xf32>
    %194 = vector.extract_strided_slice %191 {offsets = [0, 64], sizes = [16, 8], strides = [1, 1]} : vector<16x96xf32> to vector<16x8xf32>
    %cst_85 = arith.constant dense<0.000000e+00> : vector<16x16xf32>
    %195 = tpu.matmul %192, %193, %cst_85 {dimension_numbers = #tpu.dot_dimension_numbers<[1], [1], [0], [0], [0, 0, 1, 0], [], []>} : vector<16x8xf32>, vector<16x8xf32>, vector<16x16xf32> -> vector<16x16xf32>
    %cst_86 = arith.constant 0.353553385 : f32
    %196 = vector.broadcast %cst_86 : f32 to vector<16x16xf32>
    %197 = arith.mulf %195, %196 : vector<16x16xf32>
    %198 = arith.addf %197, %34 : vector<16x16xf32>
    %cst_87 = arith.constant dense<0xFF800000> : vector<16xf32>
    %199 = vector.multi_reduction <maximumf>, %198, %cst_87 [1] : vector<16x16xf32> to vector<16xf32>
    %200 = vector.shape_cast %199 : vector<16xf32> to vector<16x1xf32>
    %201 = vector.broadcast %200 : vector<16x1xf32> to vector<16x16xf32>
    %202 = arith.subf %198, %201 : vector<16x16xf32>
    %203 = math.exp %202 : vector<16x16xf32>
    %cst_88 = arith.constant dense<0.000000e+00> : vector<16xf32>
    %204 = vector.multi_reduction <add>, %203, %cst_88 [1] : vector<16x16xf32> to vector<16xf32>
    %205 = vector.shape_cast %204 : vector<16xf32> to vector<16x1xf32>
    %206 = tpu.reciprocal %205 {approx = true} : vector<16x1xf32> -> vector<16x1xf32>
    %207 = vector.broadcast %206 : vector<16x1xf32> to vector<16x16xf32>
    %208 = arith.mulf %203, %207 : vector<16x16xf32>
    %cst_89 = arith.constant dense<0.000000e+00> : vector<16x8xf32>
    %209 = tpu.matmul %208, %194, %cst_89 {dimension_numbers = #tpu.dot_dimension_numbers<[1], [0], [0], [1], [0, 0, 1, 1], [], []>} : vector<16x16xf32>, vector<16x8xf32>, vector<16x8xf32> -> vector<16x8xf32>
    %210 = vector.extract_strided_slice %191 {offsets = [0, 8], sizes = [16, 8], strides = [1, 1]} : vector<16x96xf32> to vector<16x8xf32>
    %211 = vector.extract_strided_slice %191 {offsets = [0, 40], sizes = [16, 8], strides = [1, 1]} : vector<16x96xf32> to vector<16x8xf32>
    %212 = vector.extract_strided_slice %191 {offsets = [0, 72], sizes = [16, 8], strides = [1, 1]} : vector<16x96xf32> to vector<16x8xf32>
    %cst_90 = arith.constant dense<0.000000e+00> : vector<16x16xf32>
    %213 = tpu.matmul %210, %211, %cst_90 {dimension_numbers = #tpu.dot_dimension_numbers<[1], [1], [0], [0], [0, 0, 1, 0], [], []>} : vector<16x8xf32>, vector<16x8xf32>, vector<16x16xf32> -> vector<16x16xf32>
    %cst_91 = arith.constant 0.353553385 : f32
    %214 = vector.broadcast %cst_91 : f32 to vector<16x16xf32>
    %215 = arith.mulf %213, %214 : vector<16x16xf32>
    %216 = arith.addf %215, %34 : vector<16x16xf32>
    %cst_92 = arith.constant dense<0xFF800000> : vector<16xf32>
    %217 = vector.multi_reduction <maximumf>, %216, %cst_92 [1] : vector<16x16xf32> to vector<16xf32>
    %218 = vector.shape_cast %217 : vector<16xf32> to vector<16x1xf32>
    %219 = vector.broadcast %218 : vector<16x1xf32> to vector<16x16xf32>
    %220 = arith.subf %216, %219 : vector<16x16xf32>
    %221 = math.exp %220 : vector<16x16xf32>
    %cst_93 = arith.constant dense<0.000000e+00> : vector<16xf32>
    %222 = vector.multi_reduction <add>, %221, %cst_93 [1] : vector<16x16xf32> to vector<16xf32>
    %223 = vector.shape_cast %222 : vector<16xf32> to vector<16x1xf32>
    %224 = tpu.reciprocal %223 {approx = true} : vector<16x1xf32> -> vector<16x1xf32>
    %225 = vector.broadcast %224 : vector<16x1xf32> to vector<16x16xf32>
    %226 = arith.mulf %221, %225 : vector<16x16xf32>
    %cst_94 = arith.constant dense<0.000000e+00> : vector<16x8xf32>
    %227 = tpu.matmul %226, %212, %cst_94 {dimension_numbers = #tpu.dot_dimension_numbers<[1], [0], [0], [1], [0, 0, 1, 1], [], []>} : vector<16x16xf32>, vector<16x8xf32>, vector<16x8xf32> -> vector<16x8xf32>
    %228 = vector.extract_strided_slice %191 {offsets = [0, 16], sizes = [16, 8], strides = [1, 1]} : vector<16x96xf32> to vector<16x8xf32>
    %229 = vector.extract_strided_slice %191 {offsets = [0, 48], sizes = [16, 8], strides = [1, 1]} : vector<16x96xf32> to vector<16x8xf32>
    %230 = vector.extract_strided_slice %191 {offsets = [0, 80], sizes = [16, 8], strides = [1, 1]} : vector<16x96xf32> to vector<16x8xf32>
    %cst_95 = arith.constant dense<0.000000e+00> : vector<16x16xf32>
    %231 = tpu.matmul %228, %229, %cst_95 {dimension_numbers = #tpu.dot_dimension_numbers<[1], [1], [0], [0], [0, 0, 1, 0], [], []>} : vector<16x8xf32>, vector<16x8xf32>, vector<16x16xf32> -> vector<16x16xf32>
    %cst_96 = arith.constant 0.353553385 : f32
    %232 = vector.broadcast %cst_96 : f32 to vector<16x16xf32>
    %233 = arith.mulf %231, %232 : vector<16x16xf32>
    %234 = arith.addf %233, %34 : vector<16x16xf32>
    %cst_97 = arith.constant dense<0xFF800000> : vector<16xf32>
    %235 = vector.multi_reduction <maximumf>, %234, %cst_97 [1] : vector<16x16xf32> to vector<16xf32>
    %236 = vector.shape_cast %235 : vector<16xf32> to vector<16x1xf32>
    %237 = vector.broadcast %236 : vector<16x1xf32> to vector<16x16xf32>
    %238 = arith.subf %234, %237 : vector<16x16xf32>
    %239 = math.exp %238 : vector<16x16xf32>
    %cst_98 = arith.constant dense<0.000000e+00> : vector<16xf32>
    %240 = vector.multi_reduction <add>, %239, %cst_98 [1] : vector<16x16xf32> to vector<16xf32>
    %241 = vector.shape_cast %240 : vector<16xf32> to vector<16x1xf32>
    %242 = tpu.reciprocal %241 {approx = true} : vector<16x1xf32> -> vector<16x1xf32>
    %243 = vector.broadcast %242 : vector<16x1xf32> to vector<16x16xf32>
    %244 = arith.mulf %239, %243 : vector<16x16xf32>
    %cst_99 = arith.constant dense<0.000000e+00> : vector<16x8xf32>
    %245 = tpu.matmul %244, %230, %cst_99 {dimension_numbers = #tpu.dot_dimension_numbers<[1], [0], [0], [1], [0, 0, 1, 1], [], []>} : vector<16x16xf32>, vector<16x8xf32>, vector<16x8xf32> -> vector<16x8xf32>
    %246 = vector.extract_strided_slice %191 {offsets = [0, 24], sizes = [16, 8], strides = [1, 1]} : vector<16x96xf32> to vector<16x8xf32>
    %247 = vector.extract_strided_slice %191 {offsets = [0, 56], sizes = [16, 8], strides = [1, 1]} : vector<16x96xf32> to vector<16x8xf32>
    %248 = vector.extract_strided_slice %191 {offsets = [0, 88], sizes = [16, 8], strides = [1, 1]} : vector<16x96xf32> to vector<16x8xf32>
    %cst_100 = arith.constant dense<0.000000e+00> : vector<16x16xf32>
    %249 = tpu.matmul %246, %247, %cst_100 {dimension_numbers = #tpu.dot_dimension_numbers<[1], [1], [0], [0], [0, 0, 1, 0], [], []>} : vector<16x8xf32>, vector<16x8xf32>, vector<16x16xf32> -> vector<16x16xf32>
    %cst_101 = arith.constant 0.353553385 : f32
    %250 = vector.broadcast %cst_101 : f32 to vector<16x16xf32>
    %251 = arith.mulf %249, %250 : vector<16x16xf32>
    %252 = arith.addf %251, %34 : vector<16x16xf32>
    %cst_102 = arith.constant dense<0xFF800000> : vector<16xf32>
    %253 = vector.multi_reduction <maximumf>, %252, %cst_102 [1] : vector<16x16xf32> to vector<16xf32>
    %254 = vector.shape_cast %253 : vector<16xf32> to vector<16x1xf32>
    %255 = vector.broadcast %254 : vector<16x1xf32> to vector<16x16xf32>
    %256 = arith.subf %252, %255 : vector<16x16xf32>
    %257 = math.exp %256 : vector<16x16xf32>
    %cst_103 = arith.constant dense<0.000000e+00> : vector<16xf32>
    %258 = vector.multi_reduction <add>, %257, %cst_103 [1] : vector<16x16xf32> to vector<16xf32>
    %259 = vector.shape_cast %258 : vector<16xf32> to vector<16x1xf32>
    %260 = tpu.reciprocal %259 {approx = true} : vector<16x1xf32> -> vector<16x1xf32>
    %261 = vector.broadcast %260 : vector<16x1xf32> to vector<16x16xf32>
    %262 = arith.mulf %257, %261 : vector<16x16xf32>
    %cst_104 = arith.constant dense<0.000000e+00> : vector<16x8xf32>
    %263 = tpu.matmul %262, %248, %cst_104 {dimension_numbers = #tpu.dot_dimension_numbers<[1], [0], [0], [1], [0, 0, 1, 1], [], []>} : vector<16x16xf32>, vector<16x8xf32>, vector<16x8xf32> -> vector<16x8xf32>
    %264 = tpu.concatenate %209, %227, %245, %263 in 1 : vector<16x8xf32>, vector<16x8xf32>, vector<16x8xf32>, vector<16x8xf32> -> vector<16x32xf32>
    %c0_105 = arith.constant 0 : index
    %c0_106 = arith.constant 0 : index
    %265 = vector.load %arg21[%c0_105, %c0_106] : memref<32x32xf32, #tpu.memory_space<vmem>>, vector<32x32xf32>
    %cst_107 = arith.constant dense<0.000000e+00> : vector<16x32xf32>
    %266 = tpu.matmul %264, %265, %cst_107 {dimension_numbers = #tpu.dot_dimension_numbers<[1], [0], [0], [1], [0, 0, 1, 1], [], []>} : vector<16x32xf32>, vector<32x32xf32>, vector<16x32xf32> -> vector<16x32xf32>
    %c0_108 = arith.constant 0 : index
    %c0_109 = arith.constant 0 : index
    %267 = vector.load %arg22[%c0_108, %c0_109] : memref<1x32xf32, #tpu.memory_space<vmem>>, vector<1x32xf32>
    %268 = vector.broadcast %267 : vector<1x32xf32> to vector<16x32xf32>
    %269 = arith.addf %266, %268 : vector<16x32xf32>
    %270 = arith.addf %186, %269 : vector<16x32xf32>
    %c0_110 = arith.constant 0 : index
    %c0_111 = arith.constant 0 : index
    %271 = vector.load %arg23[%c0_110, %c0_111] : memref<1x32xf32, #tpu.memory_space<vmem>>, vector<1x32xf32>
    %c0_112 = arith.constant 0 : index
    %c0_113 = arith.constant 0 : index
    %272 = vector.load %arg24[%c0_112, %c0_113] : memref<1x32xf32, #tpu.memory_space<vmem>>, vector<1x32xf32>
    %cst_114 = arith.constant dense<0.000000e+00> : vector<16xf32>
    %273 = vector.multi_reduction <add>, %270, %cst_114 [1] : vector<16x32xf32> to vector<16xf32>
    %274 = vector.shape_cast %273 : vector<16xf32> to vector<16x1xf32>
    %cst_115 = arith.constant 3.200000e+01 : f32
    %275 = vector.broadcast %cst_115 : f32 to vector<16x1xf32>
    %276 = arith.divf %274, %275 : vector<16x1xf32>
    %277 = vector.broadcast %276 : vector<16x1xf32> to vector<16x32xf32>
    %278 = arith.subf %270, %277 : vector<16x32xf32>
    %279 = arith.mulf %278, %278 : vector<16x32xf32>
    %cst_116 = arith.constant dense<0.000000e+00> : vector<16xf32>
    %280 = vector.multi_reduction <add>, %279, %cst_116 [1] : vector<16x32xf32> to vector<16xf32>
    %281 = vector.shape_cast %280 : vector<16xf32> to vector<16x1xf32>
    %cst_117 = arith.constant 3.200000e+01 : f32
    %282 = vector.broadcast %cst_117 : f32 to vector<16x1xf32>
    %283 = arith.divf %281, %282 : vector<16x1xf32>
    %cst_118 = arith.constant 9.99999974E-6 : f32
    %284 = vector.broadcast %cst_118 : f32 to vector<16x1xf32>
    %285 = arith.addf %283, %284 : vector<16x1xf32>
    %286 = math.rsqrt %285 : vector<16x1xf32>
    %287 = vector.broadcast %286 : vector<16x1xf32> to vector<16x32xf32>
    %288 = arith.mulf %278, %287 : vector<16x32xf32>
    %289 = vector.broadcast %271 : vector<1x32xf32> to vector<16x32xf32>
    %290 = arith.mulf %288, %289 : vector<16x32xf32>
    %291 = vector.broadcast %272 : vector<1x32xf32> to vector<16x32xf32>
    %292 = arith.addf %290, %291 : vector<16x32xf32>
    %c0_119 = arith.constant 0 : index
    %c0_120 = arith.constant 0 : index
    %293 = vector.load %arg25[%c0_119, %c0_120] : memref<32x128xf32, #tpu.memory_space<vmem>>, vector<32x128xf32>
    %cst_121 = arith.constant dense<0.000000e+00> : vector<16x128xf32>
    %294 = tpu.matmul %292, %293, %cst_121 {dimension_numbers = #tpu.dot_dimension_numbers<[1], [0], [0], [1], [0, 0, 1, 1], [], []>} : vector<16x32xf32>, vector<32x128xf32>, vector<16x128xf32> -> vector<16x128xf32>
    %c0_122 = arith.constant 0 : index
    %c0_123 = arith.constant 0 : index
    %295 = vector.load %arg26[%c0_122, %c0_123] : memref<1x128xf32, #tpu.memory_space<vmem>>, vector<1x128xf32>
    %296 = vector.broadcast %295 : vector<1x128xf32> to vector<16x128xf32>
    %297 = arith.addf %294, %296 : vector<16x128xf32>
    %cst_124 = arith.constant 5.000000e-01 : f32
    %298 = vector.broadcast %cst_124 : f32 to vector<16x128xf32>
    %299 = arith.mulf %298, %297 : vector<16x128xf32>
    %cst_125 = arith.constant 4.471500e-02 : f32
    %300 = vector.broadcast %cst_125 : f32 to vector<16x128xf32>
    %301 = arith.mulf %300, %297 : vector<16x128xf32>
    %302 = arith.mulf %301, %297 : vector<16x128xf32>
    %303 = arith.mulf %302, %297 : vector<16x128xf32>
    %304 = arith.addf %297, %303 : vector<16x128xf32>
    %cst_126 = arith.constant 0.797884583 : f32
    %305 = vector.broadcast %cst_126 : f32 to vector<16x128xf32>
    %306 = arith.mulf %305, %304 : vector<16x128xf32>
    %307 = math.tanh %306 : vector<16x128xf32>
    %cst_127 = arith.constant 1.000000e+00 : f32
    %308 = vector.broadcast %cst_127 : f32 to vector<16x128xf32>
    %309 = arith.addf %308, %307 : vector<16x128xf32>
    %310 = arith.mulf %299, %309 : vector<16x128xf32>
    %c0_128 = arith.constant 0 : index
    %c0_129 = arith.constant 0 : index
    %311 = vector.load %arg27[%c0_128, %c0_129] : memref<128x32xf32, #tpu.memory_space<vmem>>, vector<128x32xf32>
    %cst_130 = arith.constant dense<0.000000e+00> : vector<16x32xf32>
    %312 = tpu.matmul %310, %311, %cst_130 {dimension_numbers = #tpu.dot_dimension_numbers<[1], [0], [0], [1], [0, 0, 1, 1], [], []>} : vector<16x128xf32>, vector<128x32xf32>, vector<16x32xf32> -> vector<16x32xf32>
    %c0_131 = arith.constant 0 : index
    %c0_132 = arith.constant 0 : index
    %313 = vector.load %arg28[%c0_131, %c0_132] : memref<1x32xf32, #tpu.memory_space<vmem>>, vector<1x32xf32>
    %314 = vector.broadcast %313 : vector<1x32xf32> to vector<16x32xf32>
    %315 = arith.addf %312, %314 : vector<16x32xf32>
    %316 = arith.addf %292, %315 : vector<16x32xf32>
    %c0_133 = arith.constant 0 : index
    %c0_134 = arith.constant 0 : index
    %317 = vector.load %arg29[%c0_133, %c0_134] : memref<1x32xf32, #tpu.memory_space<vmem>>, vector<1x32xf32>
    %c0_135 = arith.constant 0 : index
    %c0_136 = arith.constant 0 : index
    %318 = vector.load %arg30[%c0_135, %c0_136] : memref<1x32xf32, #tpu.memory_space<vmem>>, vector<1x32xf32>
    %cst_137 = arith.constant dense<0.000000e+00> : vector<16xf32>
    %319 = vector.multi_reduction <add>, %316, %cst_137 [1] : vector<16x32xf32> to vector<16xf32>
    %320 = vector.shape_cast %319 : vector<16xf32> to vector<16x1xf32>
    %cst_138 = arith.constant 3.200000e+01 : f32
    %321 = vector.broadcast %cst_138 : f32 to vector<16x1xf32>
    %322 = arith.divf %320, %321 : vector<16x1xf32>
    %323 = vector.broadcast %322 : vector<16x1xf32> to vector<16x32xf32>
    %324 = arith.subf %316, %323 : vector<16x32xf32>
    %325 = arith.mulf %324, %324 : vector<16x32xf32>
    %cst_139 = arith.constant dense<0.000000e+00> : vector<16xf32>
    %326 = vector.multi_reduction <add>, %325, %cst_139 [1] : vector<16x32xf32> to vector<16xf32>
    %327 = vector.shape_cast %326 : vector<16xf32> to vector<16x1xf32>
    %cst_140 = arith.constant 3.200000e+01 : f32
    %328 = vector.broadcast %cst_140 : f32 to vector<16x1xf32>
    %329 = arith.divf %327, %328 : vector<16x1xf32>
    %cst_141 = arith.constant 9.99999974E-6 : f32
    %330 = vector.broadcast %cst_141 : f32 to vector<16x1xf32>
    %331 = arith.addf %329, %330 : vector<16x1xf32>
    %332 = math.rsqrt %331 : vector<16x1xf32>
    %333 = vector.broadcast %332 : vector<16x1xf32> to vector<16x32xf32>
    %334 = arith.mulf %324, %333 : vector<16x32xf32>
    %335 = vector.broadcast %317 : vector<1x32xf32> to vector<16x32xf32>
    %336 = arith.mulf %334, %335 : vector<16x32xf32>
    %337 = vector.broadcast %318 : vector<1x32xf32> to vector<16x32xf32>
    %338 = arith.addf %336, %337 : vector<16x32xf32>
    %339 = vector.extract_strided_slice %338 {offsets = [0, 0], sizes = [1, 32], strides = [1, 1]} : vector<16x32xf32> to vector<1x32xf32>
    %340 = vector.extract_strided_slice %338 {offsets = [8, 0], sizes = [1, 32], strides = [1, 1]} : vector<16x32xf32> to vector<1x32xf32>
    %341 = tpu.concatenate %339, %340 in 0 : vector<1x32xf32>, vector<1x32xf32> -> vector<2x32xf32>
    %c0_142 = arith.constant 0 : index
    %c0_143 = arith.constant 0 : index
    %342 = vector.load %arg31[%c0_142, %c0_143] : memref<32x32xf32, #tpu.memory_space<vmem>>, vector<32x32xf32>
    %cst_144 = arith.constant dense<0.000000e+00> : vector<2x32xf32>
    %343 = tpu.matmul %341, %342, %cst_144 {dimension_numbers = #tpu.dot_dimension_numbers<[1], [0], [0], [1], [0, 0, 1, 1], [], []>} : vector<2x32xf32>, vector<32x32xf32>, vector<2x32xf32> -> vector<2x32xf32>
    %c0_145 = arith.constant 0 : index
    %c0_146 = arith.constant 0 : index
    %344 = vector.load %arg32[%c0_145, %c0_146] : memref<1x32xf32, #tpu.memory_space<vmem>>, vector<1x32xf32>
    %345 = vector.broadcast %344 : vector<1x32xf32> to vector<2x32xf32>
    %346 = arith.addf %343, %345 : vector<2x32xf32>
    %c0_147 = arith.constant 0 : index
    %c0_148 = arith.constant 0 : index
    %347 = vector.load %arg33[%c0_147, %c0_148] : memref<1x32xf32, #tpu.memory_space<vmem>>, vector<1x32xf32>
    %c0_149 = arith.constant 0 : index
    %c0_150 = arith.constant 0 : index
    %348 = vector.load %arg34[%c0_149, %c0_150] : memref<1x32xf32, #tpu.memory_space<vmem>>, vector<1x32xf32>
    %cst_151 = arith.constant dense<0.000000e+00> : vector<2xf32>
    %349 = vector.multi_reduction <add>, %346, %cst_151 [1] : vector<2x32xf32> to vector<2xf32>
    %350 = vector.shape_cast %349 : vector<2xf32> to vector<2x1xf32>
    %cst_152 = arith.constant 3.200000e+01 : f32
    %351 = vector.broadcast %cst_152 : f32 to vector<2x1xf32>
    %352 = arith.divf %350, %351 : vector<2x1xf32>
    %353 = vector.broadcast %352 : vector<2x1xf32> to vector<2x32xf32>
    %354 = arith.subf %346, %353 : vector<2x32xf32>
    %355 = arith.mulf %354, %354 : vector<2x32xf32>
    %cst_153 = arith.constant dense<0.000000e+00> : vector<2xf32>
    %356 = vector.multi_reduction <add>, %355, %cst_153 [1] : vector<2x32xf32> to vector<2xf32>
    %357 = vector.shape_cast %356 : vector<2xf32> to vector<2x1xf32>
    %cst_154 = arith.constant 3.200000e+01 : f32
    %358 = vector.broadcast %cst_154 : f32 to vector<2x1xf32>
    %359 = arith.divf %357, %358 : vector<2x1xf32>
    %cst_155 = arith.constant 9.99999974E-6 : f32
    %360 = vector.broadcast %cst_155 : f32 to vector<2x1xf32>
    %361 = arith.addf %359, %360 : vector<2x1xf32>
    %362 = math.rsqrt %361 : vector<2x1xf32>
    %363 = vector.broadcast %362 : vector<2x1xf32> to vector<2x32xf32>
    %364 = arith.mulf %354, %363 : vector<2x32xf32>
    %365 = vector.broadcast %347 : vector<1x32xf32> to vector<2x32xf32>
    %366 = arith.mulf %364, %365 : vector<2x32xf32>
    %367 = vector.broadcast %348 : vector<1x32xf32> to vector<2x32xf32>
    %368 = arith.addf %366, %367 : vector<2x32xf32>
    %cst_156 = arith.constant 5.000000e-01 : f32
    %369 = vector.broadcast %cst_156 : f32 to vector<2x32xf32>
    %370 = arith.mulf %369, %368 : vector<2x32xf32>
    %cst_157 = arith.constant 4.471500e-02 : f32
    %371 = vector.broadcast %cst_157 : f32 to vector<2x32xf32>
    %372 = arith.mulf %371, %368 : vector<2x32xf32>
    %373 = arith.mulf %372, %368 : vector<2x32xf32>
    %374 = arith.mulf %373, %368 : vector<2x32xf32>
    %375 = arith.addf %368, %374 : vector<2x32xf32>
    %cst_158 = arith.constant 0.797884583 : f32
    %376 = vector.broadcast %cst_158 : f32 to vector<2x32xf32>
    %377 = arith.mulf %376, %375 : vector<2x32xf32>
    %378 = math.tanh %377 : vector<2x32xf32>
    %cst_159 = arith.constant 1.000000e+00 : f32
    %379 = vector.broadcast %cst_159 : f32 to vector<2x32xf32>
    %380 = arith.addf %379, %378 : vector<2x32xf32>
    %381 = arith.mulf %370, %380 : vector<2x32xf32>
    %c0_160 = arith.constant 0 : index
    %c0_161 = arith.constant 0 : index
    %382 = vector.load %arg35[%c0_160, %c0_161] : memref<32x3xf32, #tpu.memory_space<vmem>>, vector<32x3xf32>
    %cst_162 = arith.constant dense<0.000000e+00> : vector<2x3xf32>
    %383 = tpu.matmul %381, %382, %cst_162 {dimension_numbers = #tpu.dot_dimension_numbers<[1], [0], [0], [1], [0, 0, 1, 1], [], []>} : vector<2x32xf32>, vector<32x3xf32>, vector<2x3xf32> -> vector<2x3xf32>
    %c0_163 = arith.constant 0 : index
    %c0_164 = arith.constant 0 : index
    %384 = vector.load %arg36[%c0_163, %c0_164] : memref<1x3xf32, #tpu.memory_space<vmem>>, vector<1x3xf32>
    %385 = vector.broadcast %384 : vector<1x3xf32> to vector<2x3xf32>
    %386 = arith.addf %383, %385 : vector<2x3xf32>
    %c0_165 = arith.constant 0 : index
    %c0_166 = arith.constant 0 : index
    %387 = vector.load %arg37[%c0_165, %c0_166] : memref<2x3xf32, #tpu.memory_space<vmem>>, vector<2x3xf32>
    tpu.vector_store %arg37[%c0_165, %c0_166], %386 {strides = array<i32>} : memref<2x3xf32, #tpu.memory_space<vmem>>, vector<2x3xf32>,
    %c0_167 = arith.constant 0 : index
    %c0_168 = arith.constant 0 : index
    %388 = vector.load %arg2[%c0_167, %c0_168] : memref<2x1xi32, #tpu.memory_space<vmem>>, vector<2x1xi32>
    %cst_169 = arith.constant dense<0xFF800000> : vector<2xf32>
    %389 = vector.multi_reduction <maximumf>, %386, %cst_169 [1] : vector<2x3xf32> to vector<2xf32>
    %390 = vector.shape_cast %389 : vector<2xf32> to vector<2x1xf32>
    %391 = vector.broadcast %390 : vector<2x1xf32> to vector<2x3xf32>
    %392 = arith.subf %386, %391 : vector<2x3xf32>
    %393 = math.exp %392 : vector<2x3xf32>
    %cst_170 = arith.constant dense<0.000000e+00> : vector<2xf32>
    %394 = vector.multi_reduction <add>, %393, %cst_170 [1] : vector<2x3xf32> to vector<2xf32>
    %395 = vector.shape_cast %394 : vector<2xf32> to vector<2x1xf32>
    %396 = math.log %395 : vector<2x1xf32>
    %397 = tpu.iota {dimensions = array<i32: 1>} : vector<2x3xi32>
    %398 = vector.broadcast %388 : vector<2x1xi32> to vector<2x3xi32>
    %399 = arith.cmpi eq, %397, %398 : vector<2x3xi32>
    %cst_171 = arith.constant 0.000000e+00 : f32
    %400 = vector.broadcast %cst_171 : f32 to vector<2x3xf32>
    %401 = arith.select %399, %392, %400 : vector<2x3xi1>, vector<2x3xf32>
    %cst_172 = arith.constant dense<0.000000e+00> : vector<2xf32>
    %402 = vector.multi_reduction <add>, %401, %cst_172 [1] : vector<2x3xf32> to vector<2xf32>
    %403 = vector.shape_cast %402 : vector<2xf32> to vector<2x1xf32>
    %404 = arith.subf %396, %403 : vector<2x1xf32>
    %cst_173 = arith.constant dense<0.000000e+00> : vector<1xf32>
    %405 = vector.multi_reduction <add>, %404, %cst_173 [0] : vector<2x1xf32> to vector<1xf32>
    %406 = vector.shape_cast %405 : vector<1xf32> to vector<1x1xf32>
    %cst_174 = arith.constant 5.000000e-01 : f32
    %407 = vector.broadcast %cst_174 : f32 to vector<1x1xf32>
    %408 = arith.mulf %406, %407 : vector<1x1xf32>
    %c0_175 = arith.constant 0 : index
    %c0_176 = arith.constant 0 : index
    %409 = vector.load %arg38[%c0_175, %c0_176] : memref<1x1xf32, #tpu.memory_space<vmem>>, vector<1x1xf32>
    tpu.vector_store %arg38[%c0_175, %c0_176], %408 {strides = array<i32>} : memref<1x1xf32, #tpu.memory_space<vmem>>, vector<1x1xf32>,
    return
  }
}

</mosaic_0001>

<bundles_post_ra>
// kernel: model_forward.1
= control target key start
LH: loop header
LB: loop body
LE: loop exit
PB: predicated region body
PF: predicated region fallthrough
CT: control target
= control target key end

     0   :  { %s4319_s6 = smov 1   ;;  %s4320_s10 = smov 2   ;;  %s5014_s0 = inlined_call_operand.smem [shape: u32[39], index: -1, kind: input, shape index: {}] }
   0x1   :  { %s4385_s5 = sld [smem:[%s5014_s0]]   ;;  %s4321_s14 = smov 3  }
   0x2   :  { %s4390_s9 = sld [smem:[%s5014_s0 + %s4319_s6]]   ;;  %s4322_s18 = smov 4  }
   0x3   :  { %s4395_s13 = sld [smem:[%s5014_s0 + %s4320_s10]]   ;;  %s4323_s22 = smov 5  }
   0x4   :  { %s4400_s17 = sld [smem:[%s5014_s0 + %s4321_s14]]   ;;  %s4324_s26 = smov 6  }
   0x5   :  { %s4405_s21 = sld [smem:[%s5014_s0 + %s4322_s18]]   ;;  %s4325_s30 = smov 7  }
   0x6   :  { %s4410_s25 = sld [smem:[%s5014_s0 + %s4323_s22]]   ;;  %s4326_s4 = smov 8  }
   0x7   :  { %s4415_s29 = sld [smem:[%s5014_s0 + %s4324_s26]]   ;;  %s4327_s10 = smov 9  }
   0x8   :  { %s4420_s3 = sld [smem:[%s5014_s0 + %s4325_s30]]   ;;  %s4328_s15 = smov 10  }
   0x9   :  { %5020 = sst [smem:[#allocation8_spill]] %s4395_s13  ;;  %s4329_s20 = smov 11  }
   0xa   :  { %s4425_s8 = sld [smem:[%s5014_s0 + %s4326_s4]]   ;;  %s4330_s26 = smov 12  }
   0xb   :  { %s4430_s14 = sld [smem:[%s5014_s0 + %s4327_s10]]   ;;  %s4331_s1 = smov 13  }
   0xc   :  { %s4435_s19 = sld [smem:[%s5014_s0 + %s4328_s15]]   ;;  %s4332_s7 = smov 14  }
   0xd   :  { %s4440_s24 = sld [smem:[%s5014_s0 + %s4329_s20]]   ;;  %s4333_s15 = smov 15  }
   0xe   :  { %s4445_s30 = sld [smem:[%s5014_s0 + %s4330_s26]]   ;;  %s4334_s22 = smov 16  }
   0xf   :  { %s4450_s6 = sld [smem:[%s5014_s0 + %s4331_s1]]   ;;  %s4335_s28 = smov 17  }
  0x10   :  { %s4455_s12 = sld [smem:[%s5014_s0 + %s4332_s7]]   ;;  %s4336_s7 = smov 18  }
  0x11   :  { %s4460_s20 = sld [smem:[%s5014_s0 + %s4333_s15]]   ;;  %s4337_s15 = smov 19  }
  0x12   :  { %s4465_s27 = sld [smem:[%s5014_s0 + %s4334_s22]]   ;;  %s4338_s22 = smov 20  }
  0x13   :  { %s4470_s4 = sld [smem:[%s5014_s0 + %s4335_s28]]   ;;  %s4339_s28 = smov 21  }
  0x14   :  { %s4475_s13 = sld [smem:[%s5014_s0 + %s4336_s7]]   ;;  %s4340_s7 = smov 22  }
  0x16   :  { %5021 = sst [smem:[#allocation9_spill]] %s4455_s12 }
  0x17   :  { %s4480_s12 = sld [smem:[%s5014_s0 + %s4337_s15]]   ;;  %s4341_s15 = smov 23  }
  0x18   :  { %5022 = sst [smem:[#allocation10_spill]] %s4465_s27 }
  0x19   :  { %5023 = sst [smem:[#allocation11_spill]] %s4470_s4 }
  0x1a   :  { %5024 = sst [smem:[#allocation12_spill]] %s4475_s13 }
  0x1b   :  { %s4485_s27 = sld [smem:[%s5014_s0 + %s4338_s22]]   ;;  %s4342_s22 = smov 24  }
  0x1c   :  { %s4490_s4 = sld [smem:[%s5014_s0 + %s4339_s28]]   ;;  %s4343_s28 = smov 25  }
  0x1d   :  { %5025 = sst [smem:[#allocation13_spill]] %s4480_s12 }
  0x1e   :  { %s4495_s13 = sld [smem:[%s5014_s0 + %s4340_s7]]   ;;  %s4344_s7 = smov 26  }
  0x1f   :  { %s4500_s12 = sld [smem:[%s5014_s0 + %s4341_s15]]   ;;  %s4345_s15 = smov 27  }
  0x21   :  { %5026 = sst [smem:[#allocation14_spill]] %s4485_s27 }
  0x22   :  { %5027 = sst [smem:[#allocation15_spill]] %s4490_s4 }
  0x23   :  { %s4505_s27 = sld [smem:[%s5014_s0 + %s4342_s22]]   ;;  %s4346_s22 = smov 28  }
  0x24   :  { %5028 = sst [smem:[#allocation16_spill]] %s4495_s13 }
  0x25   :  { %5029 = sst [smem:[#allocation17_spill]] %s4500_s12 }
  0x26   :  { %s4510_s4 = sld [smem:[%s5014_s0 + %s4343_s28]]   ;;  %s4347_s28 = smov 29  }
  0x27   :  { %s4515_s13 = sld [smem:[%s5014_s0 + %s4344_s7]]   ;;  %s4348_s7 = smov 30  }
  0x28   :  { %s4520_s12 = sld [smem:[%s5014_s0 + %s4345_s15]]   ;;  %s4349_s15 = smov 31  }
  0x29   :  { %5030 = sst [smem:[#allocation18_spill]] %s4505_s27 }
  0x2a   :  { %s4525_s27 = sld [smem:[%s5014_s0 + %s4346_s22]]   ;;  %s4350_s22 = smov 32  }
  0x2c   :  { %5031 = sst [smem:[#allocation19_spill]] %s4510_s4 }
  0x2d   :  { %5032 = sst [smem:[#allocation20_spill]] %s4515_s13 }
  0x2e   :  { %5033 = sst [smem:[#allocation21_spill]] %s4520_s12 }
  0x2f   :  { %s4530_s4 = sld [smem:[%s5014_s0 + %s4347_s28]]   ;;  %s4351_s28 = smov 33  }
  0x30   :  { %5034 = sst [smem:[#allocation22_spill]] %s4525_s27 }
  0x31   :  { %s4535_s13 = sld [smem:[%s5014_s0 + %s4348_s7]]   ;;  %s4352_s7 = smov 34  }
  0x32   :  { %s4540_s12 = sld [smem:[%s5014_s0 + %s4349_s15]]   ;;  %s4353_s15 = smov 35  }
  0x33   :  { %s4545_s27 = sld [smem:[%s5014_s0 + %s4350_s22]]   ;;  %s4354_s22 = smov 36  }
  0x35   :  { %5035 = sst [smem:[#allocation23_spill]] %s4530_s4 }
  0x36   :  { %s4550_s4 = sld [smem:[%s5014_s0 + %s4351_s28]]   ;;  %s4355_s28 = smov 37  }
  0x37   :  { %5036 = sst [smem:[#allocation24_spill]] %s4535_s13 }
  0x38   :  { %5037 = sst [smem:[#allocation25_spill]] %s4540_s12 }
  0x39   :  { %5038 = sst [smem:[#allocation26_spill]] %s4545_s27 }
  0x3a   :  { %s4555_s13 = sld [smem:[%s5014_s0 + %s4352_s7]]   ;;  %s4356_s7 = smov 38  }
  0x3b   :  { %s4560_s12 = sld [smem:[%s5014_s0 + %s4353_s15]]  }
  0x3c   :  { %5039 = sst [smem:[#allocation27_spill]] %s4550_s4 }
  0x3d   :  { %s4565_s27 = sld [smem:[%s5014_s0 + %s4354_s22]]  }
  0x3e   :  { %s4570_s4 = sld [smem:[%s5014_s0 + %s4355_s28]]  }
  0x40   :  { %5040 = sst [smem:[#allocation28_spill]] %s4555_s13 }
  0x41   :  { %s4575_s13 = sld [smem:[%s5014_s0 + %s4356_s7]]  }
  0x42   :  { %83 = vsyncpa [#allocation3], 0  ;;  %v159_v0 = vld [vmem:[%s4385_s5] sm:$0xff]  ;;  %v4357_v2 = vmov 0   ;;  %v174_v3 = vld [vmem:[%s4400_s17 + $0x8] sm:$0xff] }
  0x43   :  { %v173_v1 = vld [vmem:[%s4400_s17] sm:$0xff]  ;;  %4088 = vset.pattern.permute.xlu0 %v4357_v2  ;;  %v175_v4 = vld [vmem:[%s4400_s17 + $0x10] sm:$0xff]  ;;  %v176_v5 = vld [vmem:[%s4400_s17 + $0x18] sm:$0xff] }
  0x44   :  { %164 = vperm.xlu0 %4088, %v159_v0   ;;  %v3814_v6 = vpack.c.bf16 %v174_v3, %v173_v1  ;;  %v3818_v7 = vpack.c.bf16 %v176_v5, %v175_v4 }
  0x45   :  { %84 = vsyncpa [#allocation5], 0  ;;  %v160_v8 = vld [vmem:[%s4385_s5 + $0x8] sm:$0xff]  ;;  %v177_v9 = vld [vmem:[%s4400_s17 + $0x20] sm:$0xff]  ;;  %vm188_vm0 = vcmask 1041408   ;;  %v161_v13 = vlaneseq  ;;  %vm181_vm1 = vcmask 408576  }
  0x46   :  { %v178_v10 = vld [vmem:[%s4400_s17 + $0x28] sm:$0xff]  ;;  %3815 = vmatprep.subr.bf16.mxu0 %v3814_v6  ;;  %v179_v12 = vld [vmem:[%s4400_s17 + $0x30] sm:$0x3]  ;;  %v4358_v16 = vmov 0.0   ;;  %v180_v20 = vld [vmem:[%s4405_s21] sm:$0xff]  ;;  %vm269_vm4 = vcmask 261120  }
  0x47   :  { %3817 = vmatpush3.bf16.msra.mxu0 %v3814_v6  ;;  %v3822_v11 = vpack.c.bf16 %v178_v10, %v177_v9  ;;  %v4588_v14 = vand.u32 127, %v161_v13  ;;  %v315_v37 = vld [vmem:[%s4420_s3] sm:$0xff]  ;;  %v316_v38 = vld [vmem:[%s4420_s3 + $0x8] sm:$0xff]  ;;  %v317_v39 = vld [vmem:[%s4420_s3 + $0x10] sm:$0xff]  ;;  %vm413_vm5 = vcmask 64512   ;;  %s4359_s0 = smov 120  }
  0x48   :  { %167 = vperm.xlu0 %4088, %v160_v8   ;;  %3819 = vmatprep.subr.bf16.mxu0 %v3818_v7  ;;  %v3826_v40 = vpack.c.bf16 %v316_v38, %v315_v37  ;;  %v318_v41 = vld [vmem:[%s4420_s3 + $0x18] sm:$0xff]  ;;  %v3288_v50 = vld [vmem:[%s4410_s25] ss:$0 sm:$0xff]  ;;  %s4360_s5 = smov 96   ;;  %s4361_s17 = smov 88   ;;  %vm4640_vm6 = vmpackc.low %vm413_vm5, %vm413_vm5  ;;  %vm501_vm7 = vcmask 130048  }
  0x49   :  { %v3830_v42 = vpack.c.bf16 %v318_v41, %v317_v39  ;;  %v3289_v52 = vld [vmem:[%s4415_s29] ss:$0 sm:$0xff]  ;;  %s4362_s21 = smov 80   ;;  %s4363_s25 = smov 112   ;;  %vm1251_vm8 = vcmask 195584   ;;  %vm4374_vm9 = vmmov 0  }
  0x4a   :  { %3827 = vmatprep.subr.bf16.mxu1 %v3826_v40  ;;  %v3290_v59 = vld [vmem:[%s4425_s8] ss:$0 sm:$0xff]  ;;  %s4364_s29 = smov 72   ;;  %s4365_s3 = smov 48   ;;  %vm2977_vm10 = vcmask 1040384   ;;  %vm3065_vm11 = vcmask 254976  }
  0x4b   :  { %3821 = vmatpush3.bf16.msra.mxu0 %v3818_v7  ;;  %3829 = vmatpush3.bf16.msra.mxu1 %v3826_v40  ;;  %s4366_s8 = smov 104   ;;  %s4367_s15 = smov 56   ;;  %vm3186_vm12 = vcmask 17408  }
  0x4c   :  { %3823 = vmatprep.subr.bf16.mxu0 %v3822_v11  ;;  %3831 = vmatprep.subr.bf16.mxu1 %v3830_v42  ;;  %s4368_s16 = smov 40   ;;  %s4369_s18 = smov 64  }
  0x4d   :  { %s4370_s22 = smov 8   ;;  %s4371_s23 = smov 16  }
  0x4e   :  { %s5048_s26 = sld [smem:[#allocation14_spill]]  ;;  %s5050_s28 = sld [smem:[#allocation16_spill]] }
  0x4f   :  { %3825 = vmatpush3.bf16.msra.mxu0 %v3822_v11  ;;  %3833 = vmatpush3.bf16.msra.mxu1 %v3830_v42  ;;  %s5051_s1 = sld [smem:[#allocation19_spill]]  ;;  %s5052_s2 = sld [smem:[#allocation21_spill]] }
  0x50   :  { %3539 = vmatprep.subr.msk.mxu0 %vm188_vm0, %v179_v12  ;;  %s5053_s7 = sld [smem:[#allocation17_spill]]  ;;  %s5054_s10 = sld [smem:[#allocation18_spill]] }
  0x51   :  { %s5055_s11 = sld [smem:[#allocation20_spill]] }
  0x53   :  { %3540 = vmatpush3.msk.msra.mxu0 %vm188_vm0, %v179_v12 }
  0xc3   :  { %v165_v15 = vpop.permute.xlu0 %164 }
  0xc4   :  { %vm169_vm2 = vcmp.eq.s32.totalorder %v4588_v14, %v165_v15 }
  0xc5   :  { %v171_v17 = vsel %vm169_vm2, 1.0, %v4358_v16 }
  0xc6   :  { %3541 = vmatprep.mubr.msk.f32.mxu0 %vm181_vm1, %v171_v17 }
  0xc7   :  { %v168_v18 = vpop.permute.xlu0 %167 }
  0xc8   :  { %vm170_vm3 = vcmp.eq.s32.totalorder %v4588_v14, %v168_v18 }
  0xc9   :  { %v172_v19 = vsel %vm170_vm3, 1.0, %v4358_v16 }
  0xca   :  { %3542 = vmatmul.mubr.msk.f32.vlgmr.msra.gmra.mrb[0].mxu0 %vm181_vm1, %v172_v19 }
 0x19d   :  { %v3543_v21 = vpop.f32.mrb[0].mxu0 }
 0x19e   :  { %v258_v22 = vpop.f32.mrb[1].mxu0  ;;  %v264_v24 = vadd.f32 %v3543_v21, %v180_v20 }
 0x19f   :  { %v259_v23 = vadd.f32 %v258_v22, %v180_v20 }
 0x1a0   :  { %v273_v26 = vsel %vm269_vm4, %v264_v24, 0.0 }
 0x1a1   :  { %v270_v25 = vsel %vm269_vm4, %v259_v23, 0.0 }
 0x1a2   :  { %271 = vadd.xlane.f32.xlu1 %v270_v25 }
 0x1a6   :  { %274 = vadd.xlane.f32.xlu1 %v273_v26 }
 0x22f   :  { %v272_v27 = vpop.xlane.xlu1 %271 }
 0x230   :  { %v277_v28 = vmul.f32 0.03125, %v272_v27 }
 0x232   :  { %v279_v29 = vsub.f32 %v259_v23, %v277_v28  ;;  %v4663_v28 = vld [vmem:[%s4390_s9 + $0x8] sm:$0xff] }
 0x233   :  { %v275_v30 = vpop.xlane.xlu1 %274 }
 0x234   :  { %v278_v31 = vmul.f32 0.03125, %v275_v30  ;;  %v281_v32 = vmul.f32 %v279_v29, %v279_v29  ;;  %v4667_v30 = vld [vmem:[%s4390_s9] sm:$0xff] }
 0x236   :  { %v280_v33 = vsub.f32 %v264_v24, %v278_v31  ;;  %v283_v34 = vsel %vm269_vm4, %v281_v32, 0.0 }
 0x237   :  { %284 = vadd.xlane.f32.xlu0 %v283_v34 }
 0x238   :  { %v282_v35 = vmul.f32 %v280_v33, %v280_v33 }
 0x23a   :  { %v286_v36 = vsel %vm269_vm4, %v282_v35, 0.0 }
 0x23b   :  { %287 = vadd.xlane.f32.xlu1 %v286_v36 }
 0x2c4   :  { %v285_v43 = vpop.xlane.xlu0 %284 }
 0x2c5   :  { %v289_v44 = vmul.f32 0.03125, %v285_v43 }
 0x2c7   :  { %v291_v45 = vadd.f32 1e-05, %v289_v44 }
 0x2c8   :  { %v288_v46 = vpop.xlane.xlu1 %287 }
 0x2c9   :  { %4169 = vrsqrt.f32 %v291_v45  ;;  %v290_v47 = vmul.f32 0.03125, %v288_v46 }
 0x2cb   :  { %v292_v48 = vadd.f32 1e-05, %v290_v47 }
 0x2cd   :  { %4171 = vrsqrt.f32 %v292_v48 }
 0x2d3   :  { %v4170_v49 = vpop.eup %4169 }
 0x2d4   :  { %v295_v51 = vmul.f32 %v4170_v49, %v279_v29 }
 0x2d6   :  { %v303_v53 = vmul.f32 %v3288_v50, %v295_v51 }
 0x2d7   :  { %v4172_v54 = vpop.eup %4171 }
 0x2d8   :  { %v296_v55 = vmul.f32 %v4172_v54, %v280_v33  ;;  %v4605_v56 = vadd.f32 %v3289_v52, %v303_v53 }
 0x2da   :  { %v304_v57 = vmul.f32 %v3288_v50, %v296_v55  ;;  %3552 = vmatprep.mubr.msk.f32.mxu1 %vm269_vm4, %v4605_v56 }
 0x2dc   :  { %v4609_v58 = vadd.f32 %v3289_v52, %v304_v57 }
 0x2de   :  { %3553 = vmatmul.mubr.msk.f32.vlgmr.msra.gmra.mrb[0].mxu1 %vm269_vm4, %v4609_v58 }
 0x3b1   :  { %v3554_v60 = vpop.f32.mrb[0].mxu1 }
 0x3b2   :  { %v4614_v61 = vadd.f32 %v3554_v60, %v3290_v59  ;;  %v398_v62 = vpop.f32.mrb[1].mxu1 }
 0x3b3   :  { %v4616_v63 = vadd.f32 %v3290_v59, %v398_v62 }
 0x3b4   :  { %613 = vrot.lane.b32.xlu0 %v4614_v61, %s4359_s0 }
 0x3b5   :  { %3559 = vmatprep.mubr.msk.f32.mxu1 %vm413_vm5, %v4616_v63  ;;  %v4624_v0 = vpack.i.bf16 %v4614_v61, %v4616_v63 }
 0x3b7   :  { %4090 = vrot.lane.b32.xlu1 %v4624_v0, %s4360_s5 }
 0x3bb   :  { %4095 = vrot.lane.b32.xlu1 %v4624_v0, %s4361_s17 }
 0x3bf   :  { %4100 = vrot.lane.b32.xlu1 %v4624_v0, %s4362_s21 }
 0x3c3   :  { %611 = vrot.lane.b32.xlu1 %v4616_v63, %s4359_s0 }
 0x3c7   :  { %815 = vrot.lane.b32.xlu1 %v4616_v63, %s4363_s25 }
 0x3cb   :  { %817 = vrot.lane.b32.xlu1 %v4614_v61, %s4363_s25 }
 0x426   :  { %v614_v17 = vpop.permute.xlu0 %613 }
 0x429   :  { %v4091_v1 = vpop.permute.xlu1 %4090 }
 0x42a   :  { %v4093_v2 = vunpack.i.h.bf16 %v4091_v1  ;;  %v4092_v3 = vunpack.i.l.bf16 %v4091_v1 }
 0x42c   :  { %v3834_v5 = vpack.c.bf16 %v4093_v2, %v4092_v3 }
 0x42d   :  { %v4096_v6 = vpop.permute.xlu1 %4095 }
 0x42e   :  { %v4098_v7 = vunpack.i.h.bf16 %v4096_v6  ;;  %v4097_v8 = vunpack.i.l.bf16 %v4096_v6  ;;  %3836 = vmatprep.subr.msk.bf16.mxu1 %vm4640_vm6, %v3834_v5 }
 0x42f   :  { %3839 = vmatpush3.bf16.xpose.msk.msra.mxu1 %vm4640_vm6, %v3834_v5 }
 0x430   :  { %v3844_v9 = vpack.c.bf16 %v4098_v7, %v4097_v8 }
 0x431   :  { %v4101_v10 = vpop.permute.xlu1 %4100 }
 0x432   :  { %v4103_v11 = vunpack.i.h.bf16 %v4101_v10  ;;  %v4102_v12 = vunpack.i.l.bf16 %v4101_v10  ;;  %3846 = vmatprep.subr.msk.bf16.mxu1 %vm4640_vm6, %v3844_v9 }
 0x434   :  { %v3854_v15 = vpack.c.bf16 %v4103_v11, %v4102_v12 }
 0x435   :  { %v612_v13 = vpop.permute.xlu1 %611 }
 0x436   :  { %3560 = vmatmul.mubr.msk.f32.vlgmr.msra.gmra.mrb[2].mxu1 %vm413_vm5, %v4614_v61 }
 0x437   :  { %3849 = vmatpush3.bf16.xpose.msk.msra.mxu1 %vm4640_vm6, %v3844_v9  ;;  %3573 = vmatprep.mubr.msk.f32.mxu1 %vm413_vm5, %v612_v13 }
 0x438   :  { %3856 = vmatprep.subr.msk.bf16.mxu1 %vm4640_vm6, %v3854_v15 }
 0x439   :  { %v816_v18 = vpop.permute.xlu1 %815 }
 0x43d   :  { %v818_v19 = vpop.permute.xlu1 %817 }
 0x43e   :  { %3574 = vmatmul.mubr.msk.f32.vlgmr.msra.gmra.mrb[4].mxu1 %vm413_vm5, %v614_v17 }
 0x43f   :  { %3859 = vmatpush3.bf16.xpose.msk.msra.mxu1 %vm4640_vm6, %v3854_v15  ;;  %3587 = vmatprep.mubr.msk.f32.mxu1 %vm413_vm5, %v816_v18 }
 0x446   :  { %3588 = vmatmul.mubr.msk.f32.vlgmr.msra.gmra.mrb[6].mxu1 %vm413_vm5, %v818_v19 }
 0x509   :  { %v3561_v20 = vpop.f32.mrb[2].mxu1 }
 0x50a   :  { %v488_v21 = vpop.f32.mrb[3].mxu1  ;;  %v498_v34 = vmul.f32 0.35355338, %v3561_v20 }
 0x50b   :  { %v497_v60 = vmul.f32 0.35355338, %v488_v21 }
 0x50c   :  { %v500_v36 = vadd.f32 %v498_v34, %v4663_v28 }
 0x50d   :  { %v499_v62 = vadd.f32 %v497_v60, %v4667_v30 }
 0x50e   :  { %v505_v37 = vsel %vm501_vm7, %v500_v36, -inf }
 0x50f   :  { %v502_v1 = vsel %vm501_vm7, %v499_v62, -inf }
 0x511   :  { %v3575_v22 = vpop.f32.mrb[4].mxu1 }
 0x512   :  { %v693_v23 = vpop.f32.mrb[5].mxu1 }
 0x513   :  { %v702_v35 = vmul.f32 0.35355338, %v693_v23 }
 0x515   :  { %v4681_v38 = vadd.f32 %v702_v35, %v4667_v30 }
 0x517   :  { %v706_v39 = vsel %vm501_vm7, %v4681_v38, -inf }
 0x519   :  { %v3589_v24 = vpop.f32.mrb[6].mxu1 }
 0x51a   :  { %v907_v25 = vmul.f32 0.35355338, %v3589_v24  ;;  %v897_v26 = vpop.f32.mrb[7].mxu1 }
 0x51b   :  { %v906_v27 = vmul.f32 0.35355338, %v897_v26 }
 0x51c   :  { %v909_v29 = vadd.f32 %v907_v25, %v4663_v28 }
 0x51d   :  { %v908_v31 = vadd.f32 %v906_v27, %v4667_v30 }
 0x51e   :  { %v913_v32 = vsel %vm501_vm7, %v909_v29, -inf }
 0x51f   :  { %914 = vmax.xlane.f32.xlu0 %v913_v32  ;;  %v910_v33 = vsel %vm501_vm7, %v908_v31, -inf }
 0x520   :  { %911 = vmax.xlane.f32.xlu1 %v910_v33 }
 0x531   :  { %4110 = vrot.lane.b32.xlu1 %v4624_v0, %s4364_s29 }
 0x535   :  { %4105 = vrot.lane.b32.xlu0 %v4624_v0, %s4365_s3 }
 0x539   :  { %1021 = vrot.lane.b32.xlu0 %v4614_v61, %s4366_s8  ;;  %v703_v61 = vmul.f32 0.35355338, %v3575_v22 }
 0x53b   :  { %v705_v2 = vadd.f32 %v703_v61, %v4663_v28 }
 0x53d   :  { %v709_v3 = vsel %vm501_vm7, %v705_v2, -inf }
 0x558   :  { %506 = vmax.xlane.f32.xlu0 %v505_v37 }
 0x55c   :  { %707 = vmax.xlane.f32.xlu0 %v706_v39 }
 0x5ac   :  { %v915_v40 = vpop.xlane.xlu0 %914 }
 0x5ad   :  { %v917_v41 = vsub.f32 %v909_v29, %v915_v40  ;;  %v912_v42 = vpop.xlane.xlu1 %911 }
 0x5ae   :  { %v916_v43 = vsub.f32 %v908_v31, %v912_v42 }
 0x5af   :  { %v920_v44 = vmul.f32 1.442695, %v917_v41 }
 0x5b0   :  { %v918_v45 = vmul.f32 1.442695, %v916_v43  ;;  %v4106_v46 = vpop.permute.xlu0 %4105 }
 0x5b1   :  { %4173 = vpow2.f32 %v920_v44  ;;  %v4108_v47 = vunpack.i.h.bf16 %v4106_v46  ;;  %v4107_v48 = vunpack.i.l.bf16 %v4106_v46  ;;  %v4111_v49 = vpop.permute.xlu1 %4110 }
 0x5b2   :  { %v4113_v50 = vunpack.i.h.bf16 %v4111_v49  ;;  %v4112_v51 = vunpack.i.l.bf16 %v4111_v49  ;;  %4175 = vpow2.f32 %v918_v45 }
 0x5b3   :  { %v3860_v52 = vpack.c.bf16 %v4108_v47, %v4107_v48 }
 0x5b4   :  { %v3864_v53 = vpack.c.bf16 %v4113_v50, %v4112_v51  ;;  %v1022_v11 = vpop.permute.xlu0 %1021 }
 0x5b5   :  { %3861 = vmatprep.subr.bf16.mxu1 %v3860_v52 }
 0x5b6   :  { %3863 = vmatpush3.bf16.msra.mxu1 %v3860_v52 }
 0x5b7   :  { %3866 = vmatprep.subr.msk.bf16.mxu1 %vm4640_vm6, %v3864_v53 }
 0x5bb   :  { %v4174_v54 = vpop.eup %4173 }
 0x5bc   :  { %v925_v55 = vsel %vm501_vm7, %v4174_v54, 0.0  ;;  %v4176_v57 = vpop.eup %4175 }
 0x5bd   :  { %926 = vadd.xlane.f32.xlu1 %v925_v55  ;;  %v922_v59 = vsel %vm501_vm7, %v4176_v57, 0.0 }
 0x5c1   :  { %923 = vadd.xlane.f32.xlu1 %v922_v59 }
 0x5d2   :  { %1019 = vrot.lane.b32.xlu1 %v4616_v63, %s4366_s8 }
 0x5e5   :  { %v507_v13 = vpop.xlane.xlu0 %506 }
 0x5e6   :  { %v509_v15 = vsub.f32 %v500_v36, %v507_v13 }
 0x5e8   :  { %v512_v20 = vmul.f32 1.442695, %v509_v15 }
 0x5e9   :  { %v708_v19 = vpop.xlane.xlu0 %707 }
 0x5ea   :  { %v712_v23 = vsub.f32 %v4681_v38, %v708_v19 }
 0x5ec   :  { %v714_v27 = vmul.f32 1.442695, %v712_v23 }
 0x5f6   :  { %503 = vmax.xlane.f32.xlu1 %v502_v1 }
 0x5fa   :  { %710 = vmax.xlane.f32.xlu1 %v709_v3 }
 0x64a   :  { %v927_v5 = vpop.xlane.xlu1 %926 }
 0x64b   :  { %4177 = vrcp.f32 %v927_v5 }
 0x64e   :  { %v924_v6 = vpop.xlane.xlu1 %923 }
 0x64f   :  { %4179 = vrcp.f32 %v924_v6 }
 0x650   :  { %4181 = vpow2.f32 %v512_v20 }
 0x652   :  { %v1020_v10 = vpop.permute.xlu1 %1019 }
 0x655   :  { %v4178_v7 = vpop.eup %4177 }
 0x656   :  { %v931_v63 = vmul.f32 %v4178_v7, %v4174_v54 }
 0x659   :  { %v4180_v8 = vpop.eup %4179 }
 0x65a   :  { %v930_v9 = vmul.f32 %v4180_v8, %v4176_v57  ;;  %v4709_v37 = vpop.eup %4181 }
 0x65b   :  { %v517_v40 = vsel %vm501_vm7, %v4709_v37, 0.0 }
 0x65c   :  { %3594 = vmatprep.mubr.msk.f32.mxu1 %vm501_vm7, %v930_v9 }
 0x65d   :  { %3595 = vmatmul.mubr.msk.f32.vlgmr.msra.gmra.mrb[8].mxu1 %vm501_vm7, %v931_v63 }
 0x65e   :  { %3869 = vmatpush3.bf16.xpose.msk.msra.mxu1 %vm4640_vm6, %v3864_v53  ;;  %3601 = vmatprep.mubr.msk.f32.mxu1 %vm413_vm5, %v1020_v10 }
 0x665   :  { %3602 = vmatmul.mubr.msk.f32.vlgmr.msra.gmra.mrb[10].mxu1 %vm413_vm5, %v1022_v11 }
 0x683   :  { %v504_v12 = vpop.xlane.xlu1 %503 }
 0x684   :  { %v508_v17 = vsub.f32 %v499_v62, %v504_v12 }
 0x686   :  { %v510_v24 = vmul.f32 1.442695, %v508_v17 }
 0x687   :  { %v711_v18 = vpop.xlane.xlu1 %710 }
 0x688   :  { %v713_v21 = vsub.f32 %v705_v2, %v711_v18  ;;  %4183 = vpow2.f32 %v510_v24 }
 0x68a   :  { %v716_v26 = vmul.f32 1.442695, %v713_v21 }
 0x68c   :  { %4185 = vpow2.f32 %v716_v26 }
 0x68d   :  { %4187 = vpow2.f32 %v714_v27 }
 0x692   :  { %v4184_v39 = vpop.eup %4183 }
 0x693   :  { %v514_v42 = vsel %vm501_vm7, %v4184_v39, 0.0 }
 0x696   :  { %v4714_v41 = vpop.eup %4185 }
 0x697   :  { %v4188_v43 = vpop.eup %4187  ;;  %v721_v44 = vsel %vm501_vm7, %v4714_v41, 0.0 }
 0x698   :  { %v718_v45 = vsel %vm501_vm7, %v4188_v43, 0.0 }
 0x730   :  { %v4701_v22 = vpop.f32.mrb[8].mxu1 }
 0x731   :  { %v4704_v25 = vpop.f32.mrb[9].mxu1 }
 0x738   :  { %v3603_v29 = vpop.f32.mrb[10].mxu1 }
 0x739   :  { %v1111_v31 = vmul.f32 0.35355338, %v3603_v29  ;;  %v1101_v32 = vpop.f32.mrb[11].mxu1 }
 0x73a   :  { %v1110_v33 = vmul.f32 0.35355338, %v1101_v32  ;;  %v1255_v32 = vld [vmem:[%s4430_s14 + $0x8] sm:$0xff] }
 0x73b   :  { %v1113_v34 = vadd.f32 %v1111_v31, %v4663_v28  ;;  %v1254_v31 = vld [vmem:[%s4430_s14] sm:$0xff] }
 0x73c   :  { %v1112_v35 = vadd.f32 %v1110_v33, %v4667_v30  ;;  %v3874_v33 = vpack.c.bf16 %v1255_v32, %v1254_v31  ;;  %v3320_v31 = vld [vmem:[%s4440_s24] ss:$0 sm:$0xff]  ;;  %s5044_s24 = sld [smem:[#allocation10_spill]] }
 0x73d   :  { %v1117_v36 = vsel %vm501_vm7, %v1113_v34, -inf }
 0x73e   :  { %1118 = vmax.xlane.f32.xlu1 %v1117_v36  ;;  %v1114_v38 = vsel %vm501_vm7, %v1112_v35, -inf }
 0x73f   :  { %1115 = vmax.xlane.f32.xlu0 %v1114_v38 }
 0x742   :  { %518 = vadd.xlane.f32.xlu1 %v517_v40 }
 0x743   :  { %515 = vadd.xlane.f32.xlu0 %v514_v42 }
 0x746   :  { %722 = vadd.xlane.f32.xlu1 %v721_v44 }
 0x747   :  { %719 = vadd.xlane.f32.xlu0 %v718_v45 }
 0x7cb   :  { %v1119_v46 = vpop.xlane.xlu1 %1118 }
 0x7cc   :  { %v1121_v47 = vsub.f32 %v1113_v34, %v1119_v46  ;;  %v1116_v48 = vpop.xlane.xlu0 %1115  ;;  %v1256_v34 = vld [vmem:[%s4430_s14 + $0x10] sm:$0xff] }
 0x7cd   :  { %v1120_v49 = vsub.f32 %v1112_v35, %v1116_v48  ;;  %v1257_v35 = vld [vmem:[%s4430_s14 + $0x18] sm:$0xff]  ;;  %s4372_s14 = smov 24  }
 0x7ce   :  { %v1124_v50 = vmul.f32 1.442695, %v1121_v47  ;;  %v3878_v36 = vpack.c.bf16 %v1257_v35, %v1256_v34 }
 0x7cf   :  { %v1122_v51 = vmul.f32 1.442695, %v1120_v49  ;;  %v519_v61 = vpop.xlane.xlu1 %518 }
 0x7d0   :  { %4189 = vpow2.f32 %v1124_v50  ;;  %v516_v52 = vpop.xlane.xlu0 %515 }
 0x7d1   :  { %4191 = vpow2.f32 %v1122_v51 }
 0x7d2   :  { %4193 = vrcp.f32 %v516_v52 }
 0x7d3   :  { %v723_v62 = vpop.xlane.xlu1 %722  ;;  %4195 = vrcp.f32 %v519_v61 }
 0x7d4   :  { %v720_v1 = vpop.xlane.xlu0 %719 }
 0x7d5   :  { %4197 = vrcp.f32 %v720_v1 }
 0x7d6   :  { %4199 = vrcp.f32 %v723_v62 }
 0x7da   :  { %v4190_v53 = vpop.eup %4189 }
 0x7db   :  { %v4192_v54 = vpop.eup %4191  ;;  %v1129_v55 = vsel %vm501_vm7, %v4190_v53, 0.0 }
 0x7dc   :  { %1130 = vadd.xlane.f32.xlu1 %v1129_v55  ;;  %v1126_v57 = vsel %vm501_vm7, %v4192_v54, 0.0  ;;  %v4194_v59 = vpop.eup %4193 }
 0x7dd   :  { %1127 = vadd.xlane.f32.xlu0 %v1126_v57  ;;  %v522_v60 = vmul.f32 %v4194_v59, %v4184_v39  ;;  %v4196_v12 = vpop.eup %4195 }
 0x7de   :  { %v523_v18 = vmul.f32 %v4196_v12, %v4709_v37 }
 0x7df   :  { %3566 = vmatprep.mubr.msk.f32.mxu0 %vm501_vm7, %v522_v60 }
 0x7ed   :  { %4120 = vrot.lane.b32.xlu1 %v4624_v0, %s4367_s15 }
 0x7f1   :  { %4125 = vrot.lane.b32.xlu1 %v4624_v0, %s4368_s16 }
 0x7f3   :  { %4115 = vrot.lane.b32.xlu0 %v4624_v0, %s4369_s18  ;;  %v4198_v0 = vpop.eup %4197 }
 0x7f4   :  { %v4200_v19 = vpop.eup %4199  ;;  %v726_v20 = vmul.f32 %v4198_v0, %v4188_v43  ;;  %v1394_v0 = vld [vmem:[%s4450_s6 + $0x10] sm:$0xff] }
 0x7f5   :  { %v727_v24 = vmul.f32 %v4200_v19, %v4714_v41 }
 0x869   :  { %v1131_v2 = vpop.xlane.xlu1 %1130 }
 0x86a   :  { %v1128_v3 = vpop.xlane.xlu0 %1127 }
 0x86b   :  { %4201 = vrcp.f32 %v1128_v3 }
 0x86c   :  { %4203 = vrcp.f32 %v1131_v2 }
 0x86d   :  { %v4121_v5 = vpop.permute.xlu1 %4120 }
 0x86e   :  { %v4116_v6 = vpop.permute.xlu0 %4115  ;;  %v4123_v7 = vunpack.i.h.bf16 %v4121_v5  ;;  %v4122_v8 = vunpack.i.l.bf16 %v4121_v5 }
 0x86f   :  { %v4118_v9 = vunpack.i.h.bf16 %v4116_v6  ;;  %v4117_v63 = vunpack.i.l.bf16 %v4116_v6 }
 0x870   :  { %v3850_v13 = vpack.c.bf16 %v4123_v7, %v4122_v8 }
 0x871   :  { %v3840_v10 = vpack.c.bf16 %v4118_v9, %v4117_v63  ;;  %v4126_v11 = vpop.permute.xlu1 %4125 }
 0x872   :  { %v4128_v15 = vunpack.i.h.bf16 %v4126_v11  ;;  %v4127_v17 = vunpack.i.l.bf16 %v4126_v11  ;;  %v1393_v11 = vld [vmem:[%s4450_s6 + $0x8] sm:$0xff] }
 0x873   :  { %3841 = vmatprep.subr.bf16.mxu0 %v3840_v10 }
 0x874   :  { %3843 = vmatpush3.bf16.msra.mxu0 %v3840_v10  ;;  %v3870_v23 = vpack.c.bf16 %v4128_v15, %v4127_v17  ;;  %v1392_v10 = vld [vmem:[%s4450_s6] sm:$0xff] }
 0x875   :  { %3851 = vmatprep.subr.bf16.mxu0 %v3850_v13  ;;  %v4202_v21 = vpop.eup %4201  ;;  %v3882_v12 = vpack.c.bf16 %v1393_v11, %v1392_v10  ;;  %v1502_v17 = vld [vmem:[%s4460_s20] sm:$0xff] }
 0x876   :  { %v4204_v26 = vpop.eup %4203  ;;  %v1134_v27 = vmul.f32 %v4202_v21, %v4192_v54 }
 0x877   :  { %3567 = vmatmul.mubr.msk.f32.vlgmr.msra.gmra.mrb[2].mxu0 %vm501_vm7, %v523_v18  ;;  %v1135_v29 = vmul.f32 %v4204_v26, %v4190_v53  ;;  %v3317_v53 = vld [vmem:[%s4435_s19] ss:$0 sm:$0xff]  ;;  %3883 = vmatprep.subr.bf16.mxu1 %v3882_v12  ;;  %v1503_v18 = vld [vmem:[%s4460_s20 + $0x8] sm:$0xff]  ;;  %s5043_s19 = sld [smem:[#allocation9_spill]] }
 0x878   :  { %3853 = vmatpush3.bf16.msra.mxu0 %v3850_v13  ;;  %3580 = vmatprep.mubr.msk.f32.mxu0 %vm501_vm7, %v726_v20  ;;  %v1395_v13 = vld [vmem:[%s4450_s6 + $0x18] sm:$0xff]  ;;  %v3890_v19 = vpack.c.bf16 %v1503_v18, %v1502_v17  ;;  %s5046_s6 = sld [smem:[#allocation11_spill]] }
 0x879   :  { %3871 = vmatprep.subr.bf16.mxu0 %v3870_v23  ;;  %3885 = vmatpush3.bf16.msra.mxu1 %v3882_v12  ;;  %v3886_v15 = vpack.c.bf16 %v1395_v13, %v1394_v0 }
 0x87b   :  { %3581 = vmatmul.mubr.msk.f32.vlgmr.msra.gmra.mrb[4].mxu0 %vm501_vm7, %v727_v24  ;;  %3887 = vmatprep.subr.bf16.mxu1 %v3886_v15 }
 0x87c   :  { %3873 = vmatpush3.bf16.msra.mxu0 %v3870_v23  ;;  %3608 = vmatprep.mubr.msk.f32.mxu0 %vm501_vm7, %v1134_v27 }
 0x87d   :  { %3875 = vmatprep.subr.bf16.mxu0 %v3874_v33  ;;  %3889 = vmatpush3.bf16.msra.mxu1 %v3886_v15 }
 0x87f   :  { %3609 = vmatmul.mubr.msk.f32.vlgmr.msra.gmra.mrb[6].mxu0 %vm501_vm7, %v1135_v29 }
 0x880   :  { %3877 = vmatpush3.bf16.msra.mxu0 %v3874_v33  ;;  %v3321_v33 = vld [vmem:[%s4445_s30] ss:$0 sm:$0xff]  ;;  %s5045_s30 = sld [smem:[#allocation13_spill]] }
 0x881   :  { %3879 = vmatprep.subr.bf16.mxu0 %v3878_v36 }
 0x884   :  { %3881 = vmatpush3.bf16.msra.mxu0 %v3878_v36 }
 0x885   :  { %3891 = vmatprep.subr.bf16.mxu0 %v3890_v19 }
 0x94a   :  { %v3568_v37 = vpop.f32.mrb[2].mxu0 }
 0x94b   :  { %v602_v38 = vpop.f32.mrb[3].mxu0 }
 0x94e   :  { %v3582_v39 = vpop.f32.mrb[4].mxu0 }
 0x94f   :  { %1227 = vrot.lane.b32.xlu1 %v3582_v39, %s4370_s22  ;;  %v806_v40 = vpop.f32.mrb[5].mxu0 }
 0x950   :  { %1225 = vrot.lane.b32.xlu0 %v806_v40, %s4370_s22  ;;  %v1504_v40 = vld [vmem:[%s4460_s20 + $0x10] sm:$0xff] }
 0x952   :  { %v3610_v41 = vpop.f32.mrb[6].mxu0 }
 0x953   :  { %1235 = vrot.lane.b32.xlu1 %v4701_v22, %s4371_s23  ;;  %v1214_v42 = vpop.f32.mrb[7].mxu0 }
 0x954   :  { %1233 = vrot.lane.b32.xlu0 %v4704_v25, %s4371_s23 }
 0x957   :  { %1243 = vrot.lane.b32.xlu1 %v3610_v41, %s4372_s14  ;;  %v1505_v41 = vld [vmem:[%s4460_s20 + $0x18] sm:$0xff] }
 0x958   :  { %1241 = vrot.lane.b32.xlu0 %v1214_v42, %s4372_s14  ;;  %v3894_v42 = vpack.c.bf16 %v1505_v41, %v1504_v40 }
 0x9c1   :  { %v1228_v43 = vpop.permute.xlu1 %1227 }
 0x9c2   :  { %v1226_v44 = vpop.permute.xlu0 %1225  ;;  %v1248_v22 = vsel %vm413_vm5, %v3568_v37, %v1228_v43  ;;  %v1506_v43 = vld [vmem:[%s4460_s20 + $0x20] sm:$0xff] }
 0x9c3   :  { %v1247_v47 = vsel %vm413_vm5, %v602_v38, %v1226_v44  ;;  %v1507_v44 = vld [vmem:[%s4460_s20 + $0x28] sm:$0xff] }
 0x9c5   :  { %v1236_v45 = vpop.permute.xlu1 %1235 }
 0x9c6   :  { %v1234_v46 = vpop.permute.xlu0 %1233  ;;  %v1250_v25 = vsel %vm501_vm7, %v1248_v22, %v1236_v45  ;;  %v3898_v45 = vpack.c.bf16 %v1507_v44, %v1506_v43  ;;  %v1646_v44 = vld [vmem:[%s5045_s30] sm:$0xff] }
 0x9c7   :  { %v1249_v49 = vsel %vm501_vm7, %v1247_v47, %v1234_v46  ;;  %v1508_v46 = vld [vmem:[%s4460_s20 + $0x30] sm:$0xff]  ;;  %v1509_v47 = vld [vmem:[%s4460_s20 + $0x38] sm:$0xff] }
 0x9c8   :  { %v3902_v22 = vpack.c.bf16 %v1509_v47, %v1508_v46  ;;  %v1648_v47 = vld [vmem:[%s5045_s30 + $0x10] sm:$0xff] }
 0x9c9   :  { %v1244_v48 = vpop.permute.xlu1 %1243 }
 0x9ca   :  { %v1242_v50 = vpop.permute.xlu0 %1241  ;;  %v1253_v52 = vsel %vm1251_vm8, %v1250_v25, %v1244_v48  ;;  %v1510_v48 = vld [vmem:[%s4460_s20 + $0x40] sm:$0xff]  ;;  %v1512_v25 = vld [vmem:[%s4460_s20 + $0x50] sm:$0xff] }
 0x9cb   :  { %v1252_v51 = vsel %vm1251_vm8, %v1249_v49, %v1242_v50  ;;  %v1511_v49 = vld [vmem:[%s4460_s20 + $0x48] sm:$0xff] }
 0x9cc   :  { %3619 = vmatprep.mubr.msk.f32.mxu0 %vm269_vm4, %v1252_v51  ;;  %v3906_v50 = vpack.c.bf16 %v1511_v49, %v1510_v48  ;;  %v1513_v51 = vld [vmem:[%s4460_s20 + $0x58] sm:$0xff] }
 0x9cd   :  { %3620 = vmatmul.mubr.msk.f32.vlgmr.msra.gmra.mrb[8].mxu0 %vm269_vm4, %v1253_v52  ;;  %v3910_v52 = vpack.c.bf16 %v1513_v51, %v1512_v25  ;;  %v1649_v48 = vld [vmem:[%s5045_s30 + $0x18] sm:$0xff] }
 0x9ce   :  { %3893 = vmatpush3.bf16.msra.mxu0 %v3890_v19 }
 0x9cf   :  { %3895 = vmatprep.subr.bf16.mxu0 %v3894_v42 }
 0x9d2   :  { %3897 = vmatpush3.bf16.msra.mxu0 %v3894_v42 }
 0x9d3   :  { %3899 = vmatprep.subr.bf16.mxu0 %v3898_v45 }
 0x9d6   :  { %3901 = vmatpush3.bf16.msra.mxu0 %v3898_v45  ;;  %v1647_v45 = vld [vmem:[%s5045_s30 + $0x8] sm:$0xff] }
 0x9d7   :  { %3903 = vmatprep.subr.bf16.mxu0 %v3902_v22  ;;  %v3922_v46 = vpack.c.bf16 %v1647_v45, %v1646_v44 }
 0x9d9   :  { %3923 = vmatprep.subr.bf16.mxu1 %v3922_v46 }
 0x9da   :  { %3905 = vmatpush3.bf16.msra.mxu0 %v3902_v22  ;;  %v3926_v22 = vpack.c.bf16 %v1649_v48, %v1648_v47 }
 0x9db   :  { %3907 = vmatprep.subr.bf16.mxu0 %v3906_v50 }
 0x9de   :  { %3909 = vmatpush3.bf16.msra.mxu0 %v3906_v50 }
 0x9df   :  { %3911 = vmatprep.subr.bf16.mxu0 %v3910_v52 }
 0x9e2   :  { %3913 = vmatpush3.bf16.msra.mxu0 %v3910_v52 }
 0xaa0   :  { %v3621_v54 = vpop.f32.mrb[8].mxu0 }
 0xaa1   :  { %v1343_v55 = vadd.f32 %v3621_v54, %v3317_v53  ;;  %v1337_v57 = vpop.f32.mrb[9].mxu0  ;;  %v1515_v54 = vld [vmem:[%s4460_s20 + $0x68] sm:$0xff] }
 0xaa2   :  { %v1338_v59 = vadd.f32 %v3317_v53, %v1337_v57  ;;  %v1514_v53 = vld [vmem:[%s4460_s20 + $0x60] sm:$0xff]  ;;  %v1516_v57 = vld [vmem:[%s4460_s20 + $0x70] sm:$0xff] }
 0xaa3   :  { %v1347_v60 = vadd.f32 %v1343_v55, %v4609_v58  ;;  %v3914_v55 = vpack.c.bf16 %v1515_v54, %v1514_v53 }
 0xaa4   :  { %v1346_v61 = vadd.f32 %v1338_v59, %v4605_v56  ;;  %v1517_v59 = vld [vmem:[%s4460_s20 + $0x78] sm:$0xff]  ;;  %s5047_s20 = sld [smem:[#allocation12_spill]] }
 0xaa5   :  { %v1353_v62 = vsel %vm269_vm4, %v1347_v60, 0.0  ;;  %3915 = vmatprep.subr.bf16.mxu0 %v3914_v55 }
 0xaa6   :  { %1354 = vadd.xlane.f32.xlu1 %v1353_v62  ;;  %v1350_v1 = vsel %vm269_vm4, %v1346_v61, 0.0  ;;  %3917 = vmatpush3.bf16.msra.mxu0 %v3914_v55  ;;  %v3326_v55 = vld [vmem:[%s5046_s6] ss:$0 sm:$0xff] }
 0xaa7   :  { %1351 = vadd.xlane.f32.xlu0 %v1350_v1 }
 0xb33   :  { %v1355_v2 = vpop.xlane.xlu1 %1354 }
 0xb34   :  { %v1357_v3 = vmul.f32 0.03125, %v1355_v2  ;;  %v1352_v5 = vpop.xlane.xlu0 %1351 }
 0xb35   :  { %v1356_v6 = vmul.f32 0.03125, %v1352_v5 }
 0xb36   :  { %v1359_v7 = vsub.f32 %v1347_v60, %v1357_v3  ;;  %v3918_v60 = vpack.c.bf16 %v1517_v59, %v1516_v57 }
 0xb37   :  { %v1358_v8 = vsub.f32 %v1346_v61, %v1356_v6  ;;  %v3322_v61 = vld [vmem:[%s5043_s19] ss:$0 sm:$0xff] }
 0xb38   :  { %v1361_v58 = vmul.f32 %v1359_v7, %v1359_v7  ;;  %3919 = vmatprep.subr.bf16.mxu0 %v3918_v60 }
 0xb39   :  { %v1360_v9 = vmul.f32 %v1358_v8, %v1358_v8  ;;  %3921 = vmatpush3.bf16.msra.mxu0 %v3918_v60 }
 0xb3a   :  { %v1365_v63 = vsel %vm269_vm4, %v1361_v58, 0.0 }
 0xb3b   :  { %v1362_v56 = vsel %vm269_vm4, %v1360_v9, 0.0 }
 0xb3c   :  { %1363 = vadd.xlane.f32.xlu0 %v1362_v56 }
 0xb40   :  { %1366 = vadd.xlane.f32.xlu0 %v1365_v63 }
 0xbc9   :  { %v1364_v20 = vpop.xlane.xlu0 %1363 }
 0xbca   :  { %v1368_v21 = vmul.f32 0.03125, %v1364_v20 }
 0xbcc   :  { %v1370_v23 = vadd.f32 1e-05, %v1368_v21  ;;  %v3325_v21 = vld [vmem:[%s5044_s24] ss:$0 sm:$0xff] }
 0xbcd   :  { %v1367_v24 = vpop.xlane.xlu0 %1366 }
 0xbce   :  { %4205 = vrsqrt.f32 %v1370_v23  ;;  %v1369_v26 = vmul.f32 0.03125, %v1367_v24 }
 0xbd0   :  { %v1371_v27 = vadd.f32 1e-05, %v1369_v26 }
 0xbd2   :  { %4207 = vrsqrt.f32 %v1371_v27 }
 0xbd8   :  { %v4206_v29 = vpop.eup %4205 }
 0xbd9   :  { %v1374_v32 = vmul.f32 %v4206_v29, %v1358_v8 }
 0xbdb   :  { %v1382_v34 = vmul.f32 %v3320_v31, %v1374_v32 }
 0xbdc   :  { %v4208_v35 = vpop.eup %4207 }
 0xbdd   :  { %v1375_v36 = vmul.f32 %v4208_v35, %v1359_v7  ;;  %v4771_v37 = vadd.f32 %v3321_v33, %v1382_v34 }
 0xbdf   :  { %v1383_v38 = vmul.f32 %v3320_v31, %v1375_v36  ;;  %3630 = vmatprep.mubr.msk.f32.mxu1 %vm269_vm4, %v4771_v37 }
 0xbe1   :  { %v4775_v39 = vadd.f32 %v3321_v33, %v1383_v38 }
 0xbe3   :  { %3631 = vmatmul.mubr.msk.f32.vlgmr.msra.gmra.mrb[12].mxu1 %vm269_vm4, %v4775_v39 }
 0xbe4   :  { %3925 = vmatpush3.bf16.msra.mxu1 %v3922_v46 }
 0xbe5   :  { %3927 = vmatprep.subr.bf16.mxu1 %v3926_v22 }
 0xbe8   :  { %3929 = vmatpush3.bf16.msra.mxu1 %v3926_v22 }
 0xcb6   :  { %v3632_v62 = vpop.f32.mrb[12].mxu1 }
 0xcb7   :  { %v1481_v1 = vadd.f32 %v3632_v62, %v3322_v61  ;;  %v1475_v2 = vpop.f32.mrb[13].mxu1 }
 0xcb8   :  { %v1476_v3 = vadd.f32 %v3322_v61, %v1475_v2  ;;  %v3327_v61 = vld [vmem:[%s5047_s20] ss:$0 sm:$0xff] }
 0xcb9   :  { %v1487_v5 = vmul.f32 0.044715, %v1481_v1  ;;  %v1485_v18 = vmul.f32 0.5, %v1481_v1 }
 0xcba   :  { %v1486_v6 = vmul.f32 0.044715, %v1476_v3  ;;  %v1484_v15 = vmul.f32 0.5, %v1476_v3 }
 0xcbb   :  { %v1489_v7 = vmul.f32 %v1487_v5, %v1481_v1  ;;  %v3328_v5 = vld [vmem:[%s5048_s26] ss:$0 sm:$0xff] }
 0xcbc   :  { %v1488_v8 = vmul.f32 %v1486_v6, %v1476_v3 }
 0xcbd   :  { %v1491_v9 = vmul.f32 %v1489_v7, %v1481_v1 }
 0xcbe   :  { %v1490_v56 = vmul.f32 %v1488_v8, %v1476_v3 }
 0xcbf   :  { %v1493_v58 = vadd.f32 %v1491_v9, %v1481_v1 }
 0xcc0   :  { %v1492_v63 = vadd.f32 %v1490_v56, %v1476_v3 }
 0xcc1   :  { %v1495_v10 = vmul.f32 0.7978846, %v1493_v58 }
 0xcc2   :  { %v1494_v11 = vmul.f32 0.7978846, %v1492_v63 }
 0xcc3   :  { %4209 = vtanh.f32 %v1495_v10 }
 0xcc4   :  { %4211 = vtanh.f32 %v1494_v11 }
 0xccd   :  { %v4210_v12 = vpop.eup %4209 }
 0xcce   :  { %v4212_v0 = vpop.eup %4211  ;;  %v1499_v13 = vadd.f32 1.0, %v4210_v12 }
 0xccf   :  { %v1498_v17 = vadd.f32 1.0, %v4212_v0 }
 0xcd0   :  { %v1501_v20 = vmul.f32 %v1499_v13, %v1485_v18 }
 0xcd1   :  { %v1500_v19 = vmul.f32 %v1498_v17, %v1484_v15 }
 0xcd3   :  { %3665 = vmatprep.mubr.f32.mxu0 %v1500_v19 }
 0xcd4   :  { %3666 = vmatmul.mubr.f32.vlgmr.msra.gmra.mrb[10].mxu0 %v1501_v20 }
 0xda7   :  { %v3667_v23 = vpop.f32.mrb[10].mxu0 }
 0xda8   :  { %v1597_v24 = vadd.f32 %v3667_v23, %v3325_v21  ;;  %v1591_v26 = vpop.f32.mrb[11].mxu0 }
 0xda9   :  { %v1592_v27 = vadd.f32 %v3325_v21, %v1591_v26 }
 0xdaa   :  { %v1601_v29 = vadd.f32 %v1597_v24, %v4775_v39 }
 0xdab   :  { %v1600_v31 = vadd.f32 %v1592_v27, %v4771_v37 }
 0xdac   :  { %v1607_v32 = vsel %vm269_vm4, %v1601_v29, 0.0 }
 0xdad   :  { %1608 = vadd.xlane.f32.xlu0 %v1607_v32  ;;  %v1604_v33 = vsel %vm269_vm4, %v1600_v31, 0.0 }
 0xdae   :  { %1605 = vadd.xlane.f32.xlu1 %v1604_v33 }
 0xe3a   :  { %v1609_v34 = vpop.xlane.xlu0 %1608 }
 0xe3b   :  { %v1611_v35 = vmul.f32 0.03125, %v1609_v34  ;;  %v1606_v36 = vpop.xlane.xlu1 %1605 }
 0xe3c   :  { %v1610_v38 = vmul.f32 0.03125, %v1606_v36 }
 0xe3d   :  { %v1613_v40 = vsub.f32 %v1601_v29, %v1611_v35 }
 0xe3e   :  { %v1612_v41 = vsub.f32 %v1600_v31, %v1610_v38 }
 0xe3f   :  { %v1615_v42 = vmul.f32 %v1613_v40, %v1613_v40 }
 0xe40   :  { %v1614_v39 = vmul.f32 %v1612_v41, %v1612_v41 }
 0xe41   :  { %v1619_v37 = vsel %vm269_vm4, %v1615_v42, 0.0 }
 0xe42   :  { %1620 = vadd.xlane.f32.xlu0 %v1619_v37  ;;  %v1616_v43 = vsel %vm269_vm4, %v1614_v39, 0.0 }
 0xe43   :  { %1617 = vadd.xlane.f32.xlu1 %v1616_v43 }
 0xecf   :  { %v1621_v49 = vpop.xlane.xlu0 %1620 }
 0xed0   :  { %v1623_v50 = vmul.f32 0.03125, %v1621_v49  ;;  %v1618_v25 = vpop.xlane.xlu1 %1617 }
 0xed1   :  { %v1622_v51 = vmul.f32 0.03125, %v1618_v25 }
 0xed2   :  { %v1625_v52 = vadd.f32 1e-05, %v1623_v50 }
 0xed3   :  { %v1624_v53 = vadd.f32 1e-05, %v1622_v51 }
 0xed4   :  { %4213 = vrsqrt.f32 %v1625_v52 }
 0xed5   :  { %4215 = vrsqrt.f32 %v1624_v53 }
 0xede   :  { %v4214_v54 = vpop.eup %4213 }
 0xedf   :  { %v4216_v57 = vpop.eup %4215  ;;  %v1629_v59 = vmul.f32 %v4214_v54, %v1613_v40 }
 0xee0   :  { %v1628_v60 = vmul.f32 %v4216_v57, %v1612_v41 }
 0xee1   :  { %v1637_v62 = vmul.f32 %v3326_v55, %v1629_v59 }
 0xee2   :  { %v1636_v1 = vmul.f32 %v3326_v55, %v1628_v60 }
 0xee3   :  { %v4809_v3 = vadd.f32 %v3327_v61, %v1637_v62 }
 0xee4   :  { %v4807_v2 = vadd.f32 %v3327_v61, %v1636_v1 }
 0xee6   :  { %3676 = vmatprep.mubr.msk.f32.mxu1 %vm269_vm4, %v4807_v2 }
 0xee7   :  { %3677 = vmatmul.mubr.msk.f32.vlgmr.msra.gmra.mrb[14].mxu1 %vm269_vm4, %v4809_v3 }
 0xfba   :  { %v3678_v6 = vpop.f32.mrb[14].mxu1 }
 0xfbb   :  { %v4816_v7 = vadd.f32 %v3678_v6, %v3328_v5  ;;  %v1729_v8 = vpop.f32.mrb[15].mxu1 }
 0xfbc   :  { %v4818_v9 = vadd.f32 %v3328_v5, %v1729_v8 }
 0xfbe   :  { %3683 = vmatprep.mubr.msk.f32.mxu1 %vm413_vm5, %v4818_v9  ;;  %v4824_v56 = vpack.i.bf16 %v4816_v7, %v4818_v9 }
 0xfc0   :  { %4130 = vrot.lane.b32.xlu1 %v4824_v56, %s4360_s5  ;;  %s5057_s5 = sld [smem:[#allocation25_spill]] }
 0xfc4   :  { %4135 = vrot.lane.b32.xlu1 %v4824_v56, %s4369_s18 }
 0xfc8   :  { %1940 = vrot.lane.b32.xlu1 %v4818_v9, %s4359_s0 }
 0xfcc   :  { %4145 = vrot.lane.b32.xlu1 %v4824_v56, %s4362_s21  ;;  %s5059_s21 = sld [smem:[#allocation24_spill]] }
 0xfd0   :  { %1942 = vrot.lane.b32.xlu1 %v4816_v7, %s4359_s0  ;;  %s5056_s0 = sld [smem:[#allocation22_spill]] }
 0xfd4   :  { %2144 = vrot.lane.b32.xlu1 %v4818_v9, %s4363_s25 }
 0xfd8   :  { %2146 = vrot.lane.b32.xlu1 %v4816_v7, %s4363_s25  ;;  %s5060_s25 = sld [smem:[#allocation26_spill]] }
0x1032   :  { %v4131_v58 = vpop.permute.xlu1 %4130 }
0x1033   :  { %v4133_v63 = vunpack.i.h.bf16 %v4131_v58  ;;  %v4132_v10 = vunpack.i.l.bf16 %v4131_v58 }
0x1035   :  { %v3930_v11 = vpack.c.bf16 %v4133_v63, %v4132_v10 }
0x1036   :  { %v4136_v12 = vpop.permute.xlu1 %4135 }
0x1037   :  { %v4138_v0 = vunpack.i.h.bf16 %v4136_v12  ;;  %v4137_v13 = vunpack.i.l.bf16 %v4136_v12  ;;  %3932 = vmatprep.subr.msk.bf16.mxu1 %vm4640_vm6, %v3930_v11 }
0x1038   :  { %3935 = vmatpush3.bf16.xpose.msk.msra.mxu1 %vm4640_vm6, %v3930_v11 }
0x1039   :  { %v3936_v15 = vpack.c.bf16 %v4138_v0, %v4137_v13 }
0x103a   :  { %v1941_v17 = vpop.permute.xlu1 %1940 }
0x103b   :  { %3937 = vmatprep.subr.bf16.mxu1 %v3936_v15 }
0x103e   :  { %v4146_v18 = vpop.permute.xlu1 %4145 }
0x103f   :  { %v4148_v19 = vunpack.i.h.bf16 %v4146_v18  ;;  %v4147_v20 = vunpack.i.l.bf16 %v4146_v18  ;;  %3684 = vmatmul.mubr.msk.f32.vlgmr.msra.gmra.mrb[16].mxu1 %vm413_vm5, %v4816_v7 }
0x1040   :  { %3939 = vmatpush3.bf16.msra.mxu1 %v3936_v15 }
0x1041   :  { %v3950_v21 = vpack.c.bf16 %v4148_v19, %v4147_v20 }
0x1042   :  { %v1943_v23 = vpop.permute.xlu1 %1942 }
0x1043   :  { %3952 = vmatprep.subr.msk.bf16.mxu0 %vm4640_vm6, %v3950_v21 }
0x1044   :  { %3955 = vmatpush3.bf16.xpose.msk.msra.mxu0 %vm4640_vm6, %v3950_v21 }
0x1046   :  { %v2145_v24 = vpop.permute.xlu1 %2144 }
0x1047   :  { %3711 = vmatprep.mubr.msk.f32.mxu0 %vm413_vm5, %v2145_v24 }
0x104a   :  { %v2147_v26 = vpop.permute.xlu1 %2146 }
0x104b   :  { %3712 = vmatmul.mubr.msk.f32.vlgmr.msra.gmra.mrb[12].mxu0 %vm413_vm5, %v2147_v26 }
0x1112   :  { %v3685_v27 = vpop.f32.mrb[16].mxu1 }
0x1113   :  { %v1818_v29 = vpop.f32.mrb[17].mxu1  ;;  %v1828_v31 = vmul.f32 0.35355338, %v3685_v27 }
0x1114   :  { %v1827_v32 = vmul.f32 0.35355338, %v1818_v29 }
0x1115   :  { %v1830_v35 = vadd.f32 %v1828_v31, %v4663_v28 }
0x1116   :  { %v1829_v33 = vadd.f32 %v1827_v32, %v4667_v30 }
0x1117   :  { %v1834_v36 = vsel %vm501_vm7, %v1830_v35, -inf }
0x1118   :  { %v1831_v34 = vsel %vm501_vm7, %v1829_v33, -inf }
0x1119   :  { %1832 = vmax.xlane.f32.xlu0 %v1831_v34 }
0x111d   :  { %1835 = vmax.xlane.f32.xlu0 %v1834_v36 }
0x111e   :  { %v3713_v38 = vpop.f32.mrb[12].mxu0 }
0x111f   :  { %v2226_v40 = vpop.f32.mrb[13].mxu0  ;;  %v2236_v10 = vmul.f32 0.35355338, %v3713_v38 }
0x1120   :  { %v2235_v5 = vmul.f32 0.35355338, %v2226_v40 }
0x1121   :  { %v2238_v13 = vadd.f32 %v2236_v10, %v4663_v28 }
0x1122   :  { %v2237_v12 = vadd.f32 %v2235_v5, %v4667_v30 }
0x1123   :  { %v2242_v15 = vsel %vm501_vm7, %v2238_v13, -inf }
0x1124   :  { %v2239_v0 = vsel %vm501_vm7, %v2237_v12, -inf }
0x11a6   :  { %v1833_v41 = vpop.xlane.xlu0 %1832 }
0x11a7   :  { %v1837_v42 = vsub.f32 %v1829_v33, %v1833_v41 }
0x11a9   :  { %v1839_v43 = vmul.f32 1.442695, %v1837_v42 }
0x11aa   :  { %v1836_v39 = vpop.xlane.xlu0 %1835 }
0x11ab   :  { %v1838_v37 = vsub.f32 %v1830_v35, %v1836_v39 }
0x11ad   :  { %v1841_v44 = vmul.f32 1.442695, %v1838_v37 }
0x11af   :  { %4217 = vpow2.f32 %v1841_v44 }
0x11b0   :  { %4219 = vpow2.f32 %v1839_v43 }
0x11b9   :  { %v4218_v45 = vpop.eup %4217 }
0x11ba   :  { %v1846_v46 = vsel %vm501_vm7, %v4218_v45, 0.0  ;;  %v4220_v47 = vpop.eup %4219 }
0x11bb   :  { %1847 = vadd.xlane.f32.xlu0 %v1846_v46  ;;  %v1843_v48 = vsel %vm501_vm7, %v4220_v47, 0.0 }
0x11bf   :  { %1844 = vadd.xlane.f32.xlu0 %v1843_v48 }
0x11d5   :  { %4140 = vrot.lane.b32.xlu0 %v4824_v56, %s4361_s17  ;;  %s5058_s17 = sld [smem:[#allocation23_spill]] }
0x1248   :  { %v1848_v22 = vpop.xlane.xlu0 %1847 }
0x1249   :  { %4221 = vrcp.f32 %v1848_v22 }
0x124c   :  { %v1845_v49 = vpop.xlane.xlu0 %1844 }
0x124d   :  { %4223 = vrcp.f32 %v1845_v49 }
0x1250   :  { %v4141_v50 = vpop.permute.xlu0 %4140 }
0x1251   :  { %v4143_v25 = vunpack.i.h.bf16 %v4141_v50  ;;  %v4142_v51 = vunpack.i.l.bf16 %v4141_v50 }
0x1253   :  { %v3940_v52 = vpack.c.bf16 %v4143_v25, %v4142_v51  ;;  %v4222_v53 = vpop.eup %4221 }
0x1254   :  { %v1852_v57 = vmul.f32 %v4222_v53, %v4218_v45 }
0x1255   :  { %3942 = vmatprep.subr.msk.bf16.mxu1 %vm4640_vm6, %v3940_v52 }
0x1257   :  { %v4224_v54 = vpop.eup %4223 }
0x1258   :  { %v1851_v55 = vmul.f32 %v4224_v54, %v4220_v47 }
0x125a   :  { %3690 = vmatprep.mubr.msk.f32.mxu1 %vm501_vm7, %v1851_v55 }
0x125b   :  { %3691 = vmatmul.mubr.msk.f32.vlgmr.msra.gmra.mrb[18].mxu1 %vm501_vm7, %v1852_v57 }
0x125c   :  { %3945 = vmatpush3.bf16.xpose.msk.msra.mxu1 %vm4640_vm6, %v3940_v52  ;;  %3697 = vmatprep.mubr.msk.f32.mxu1 %vm413_vm5, %v1941_v17 }
0x1263   :  { %3698 = vmatmul.mubr.msk.f32.vlgmr.msra.gmra.mrb[20].mxu1 %vm413_vm5, %v1943_v23 }
0x132e   :  { %v4868_v59 = vpop.f32.mrb[18].mxu1 }
0x132f   :  { %v4870_v60 = vpop.f32.mrb[19].mxu1 }
0x1336   :  { %v3699_v61 = vpop.f32.mrb[20].mxu1 }
0x1337   :  { %v2032_v62 = vmul.f32 0.35355338, %v3699_v61  ;;  %v2022_v1 = vpop.f32.mrb[21].mxu1 }
0x1338   :  { %v2031_v6 = vmul.f32 0.35355338, %v2022_v1 }
0x1339   :  { %v2034_v8 = vadd.f32 %v2032_v62, %v4663_v28 }
0x133a   :  { %v2033_v58 = vadd.f32 %v2031_v6, %v4667_v30 }
0x133b   :  { %v2038_v63 = vsel %vm501_vm7, %v2034_v8, -inf }
0x133c   :  { %2039 = vmax.xlane.f32.xlu1 %v2038_v63  ;;  %v2035_v11 = vsel %vm501_vm7, %v2033_v58, -inf }
0x133d   :  { %2036 = vmax.xlane.f32.xlu0 %v2035_v11 }
0x1341   :  { %2240 = vmax.xlane.f32.xlu0 %v2239_v0 }
0x1345   :  { %2243 = vmax.xlane.f32.xlu0 %v2242_v15 }
0x13c9   :  { %v2040_v18 = vpop.xlane.xlu1 %2039 }
0x13ca   :  { %v2037_v17 = vpop.xlane.xlu0 %2036  ;;  %v2042_v21 = vsub.f32 %v2034_v8, %v2040_v18 }
0x13cb   :  { %v2041_v35 = vsub.f32 %v2033_v58, %v2037_v17  ;;  %v4270_v17 = vld [vmem:[%s4390_s9] sm:$0xff] }
0x13cc   :  { %v2045_v27 = vmul.f32 1.442695, %v2042_v21 }
0x13cd   :  { %v2043_v36 = vmul.f32 1.442695, %v2041_v35 }
0x13ce   :  { %v2241_v19 = vpop.xlane.xlu0 %2240 }
0x13cf   :  { %v2245_v20 = vsub.f32 %v2237_v12, %v2241_v19 }
0x13d1   :  { %v2247_v23 = vmul.f32 1.442695, %v2245_v20 }
0x13d2   :  { %v2244_v24 = vpop.xlane.xlu0 %2243 }
0x13d3   :  { %4225 = vpow2.f32 %v2247_v23  ;;  %v2246_v26 = vsub.f32 %v2238_v13, %v2244_v24  ;;  %v4269_v13 = vld [vmem:[%s4390_s9 + $0x8] sm:$0xff]  ;;  %s5049_s9 = sld [smem:[#allocation15_spill]] }
0x13d5   :  { %v2249_v30 = vmul.f32 1.442695, %v2246_v26 }
0x13d7   :  { %4227 = vpow2.f32 %v2249_v30 }
0x13d8   :  { %4229 = vpow2.f32 %v2045_v27 }
0x13d9   :  { %4231 = vpow2.f32 %v2043_v36 }
0x13dd   :  { %v4226_v29 = vpop.eup %4225 }
0x13de   :  { %v2251_v28 = vsel %vm501_vm7, %v4226_v29, 0.0 }
0x13df   :  { %2252 = vadd.xlane.f32.xlu1 %v2251_v28 }
0x13e1   :  { %v4228_v31 = vpop.eup %4227 }
0x13e2   :  { %v2254_v32 = vsel %vm501_vm7, %v4228_v31, 0.0  ;;  %v4230_v33 = vpop.eup %4229 }
0x13e3   :  { %2255 = vadd.xlane.f32.xlu0 %v2254_v32  ;;  %v2050_v34 = vsel %vm501_vm7, %v4230_v33, 0.0  ;;  %v4232_v38 = vpop.eup %4231 }
0x13e4   :  { %v2047_v40 = vsel %vm501_vm7, %v4232_v38, 0.0 }
0x13e7   :  { %2051 = vadd.xlane.f32.xlu0 %v2050_v34 }
0x13f0   :  { %4150 = vrot.lane.b32.xlu1 %v4824_v56, %s4367_s15 }
0x13fd   :  { %4155 = vrot.lane.b32.xlu0 %v4824_v56, %s4365_s3  ;;  %s5062_s3 = sld [smem:[#allocation27_spill]] }
0x1401   :  { %2350 = vrot.lane.b32.xlu0 %v4816_v7, %s4366_s8 }
0x1414   :  { %2048 = vadd.xlane.f32.xlu1 %v2047_v40 }
0x1425   :  { %4160 = vrot.lane.b32.xlu1 %v4824_v56, %s4364_s29  ;;  %s5061_s29 = sld [smem:[#allocation8_spill]] }
0x1429   :  { %2348 = vrot.lane.b32.xlu1 %v4818_v9, %s4366_s8  ;;  %s5063_s8 = sld [smem:[#allocation28_spill]] }
0x146c   :  { %v2253_v41 = vpop.xlane.xlu1 %2252 }
0x146d   :  { %4233 = vrcp.f32 %v2253_v41 }
0x1470   :  { %v4151_v42 = vpop.permute.xlu1 %4150  ;;  %v2256_v39 = vpop.xlane.xlu0 %2255 }
0x1471   :  { %v4153_v37 = vunpack.i.h.bf16 %v4151_v42  ;;  %v4152_v43 = vunpack.i.l.bf16 %v4151_v42 }
0x1473   :  { %v3946_v44 = vpack.c.bf16 %v4153_v37, %v4152_v43  ;;  %v2583_v37 = vld [vmem:[%s5049_s9 + $0x8] sm:$0xff]  ;;  %v2584_v43 = vld [vmem:[%s5049_s9 + $0x10] sm:$0xff] }
0x1474   :  { %v2052_v45 = vpop.xlane.xlu0 %2051 }
0x1475   :  { %3947 = vmatprep.subr.bf16.mxu1 %v3946_v44  ;;  %4235 = vrcp.f32 %v2052_v45  ;;  %v2585_v45 = vld [vmem:[%s5049_s9 + $0x18] sm:$0xff] }
0x1476   :  { %3949 = vmatpush3.bf16.msra.mxu1 %v3946_v44 }
0x1477   :  { %v4234_v49 = vpop.eup %4233 }
0x1478   :  { %v4156_v7 = vpop.permute.xlu0 %4155  ;;  %v2259_v57 = vmul.f32 %v4234_v49, %v4226_v29 }
0x1479   :  { %v4158_v46 = vunpack.i.h.bf16 %v4156_v7  ;;  %v4157_v47 = vunpack.i.l.bf16 %v4156_v7  ;;  %v3974_v7 = vpack.c.bf16 %v2585_v45, %v2584_v43  ;;  %v2832_v43 = vld [vmem:[%s5052_s2 + $0x10] sm:$0xff] }
0x147b   :  { %v3956_v48 = vpack.c.bf16 %v4158_v46, %v4157_v47 }
0x147c   :  { %v2351_v5 = vpop.permute.xlu0 %2350 }
0x147d   :  { %3957 = vmatprep.subr.bf16.mxu1 %v3956_v48 }
0x147f   :  { %v4236_v50 = vpop.eup %4235 }
0x1480   :  { %v2056_v54 = vmul.f32 %v4236_v50, %v4230_v33 }
0x14a1   :  { %v2049_v22 = vpop.xlane.xlu1 %2048 }
0x14a2   :  { %4237 = vrcp.f32 %v2049_v22 }
0x14a3   :  { %4239 = vrcp.f32 %v2256_v39  ;;  %v2582_v39 = vld [vmem:[%s5049_s9] sm:$0xff] }
0x14a4   :  { %v3970_v44 = vpack.c.bf16 %v2583_v37, %v2582_v39 }
0x14a5   :  { %v4161_v9 = vpop.permute.xlu1 %4160 }
0x14a6   :  { %v4163_v51 = vunpack.i.h.bf16 %v4161_v9  ;;  %v4162_v52 = vunpack.i.l.bf16 %v4161_v9 }
0x14a8   :  { %v3960_v61 = vpack.c.bf16 %v4163_v51, %v4162_v52 }
0x14a9   :  { %v2349_v1 = vpop.permute.xlu1 %2348 }
0x14ac   :  { %v4238_v25 = vpop.eup %4237 }
0x14ad   :  { %v2055_v53 = vmul.f32 %v4238_v25, %v4232_v38  ;;  %v4240_v55 = vpop.eup %4239 }
0x14ae   :  { %v2260_v62 = vmul.f32 %v4240_v55, %v4228_v31 }
0x14af   :  { %3704 = vmatprep.mubr.msk.f32.mxu1 %vm501_vm7, %v2055_v53 }
0x14b0   :  { %3705 = vmatmul.mubr.msk.f32.vlgmr.msra.gmra.mrb[22].mxu1 %vm501_vm7, %v2056_v54 }
0x14b1   :  { %3959 = vmatpush3.bf16.msra.mxu1 %v3956_v48  ;;  %3718 = vmatprep.mubr.msk.f32.mxu1 %vm501_vm7, %v2259_v57 }
0x14b2   :  { %3962 = vmatprep.subr.msk.bf16.mxu1 %vm4640_vm6, %v3960_v61 }
0x14b4   :  { %3719 = vmatmul.mubr.msk.f32.vlgmr.msra.gmra.mrb[24].mxu1 %vm501_vm7, %v2260_v62 }
0x14b5   :  { %3725 = vmatprep.mubr.msk.f32.mxu1 %vm413_vm5, %v2349_v1 }
0x14ba   :  { %3965 = vmatpush3.bf16.xpose.msk.msra.mxu1 %vm4640_vm6, %v3960_v61  ;;  %v3355_v61 = vld [vmem:[%s5050_s28] ss:$0 sm:$0xff] }
0x14c1   :  { %3726 = vmatmul.mubr.msk.f32.vlgmr.msra.gmra.mrb[26].mxu1 %vm413_vm5, %v2351_v5 }
0x1583   :  { %v3706_v6 = vpop.f32.mrb[22].mxu1 }
0x1584   :  { %v2135_v8 = vpop.f32.mrb[23].mxu1 }
0x1587   :  { %v3720_v58 = vpop.f32.mrb[24].mxu1 }
0x1588   :  { %v2339_v63 = vpop.f32.mrb[25].mxu1 }
0x1594   :  { %v3727_v10 = vpop.f32.mrb[26].mxu1 }
0x1595   :  { %v2440_v11 = vmul.f32 0.35355338, %v3727_v10  ;;  %v2430_v12 = vpop.f32.mrb[27].mxu1 }
0x1596   :  { %v2439_v0 = vmul.f32 0.35355338, %v2430_v12 }
0x1597   :  { %v2442_v15 = vadd.f32 %v4269_v13, %v2440_v11 }
0x1598   :  { %v2441_v18 = vadd.f32 %v4270_v17, %v2439_v0 }
0x1599   :  { %v2446_v19 = vsel %vm501_vm7, %v2442_v15, -inf }
0x159a   :  { %2447 = vmax.xlane.f32.xlu0 %v2446_v19  ;;  %v2443_v4 = vsel %vm501_vm7, %v2441_v18, -inf  ;;  %v2721_v19 = vld [vmem:[%s5051_s1 + $0x8] sm:$0xff] }
0x159b   :  { %2444 = vmax.xlane.f32.xlu1 %v2443_v4 }
0x1627   :  { %v2448_v20 = vpop.xlane.xlu0 %2447 }
0x1628   :  { %v2450_v21 = vsub.f32 %v2442_v15, %v2448_v20  ;;  %v2445_v23 = vpop.xlane.xlu1 %2444  ;;  %v2722_v20 = vld [vmem:[%s5051_s1 + $0x10] sm:$0xff] }
0x1629   :  { %v2449_v24 = vsub.f32 %v2441_v18, %v2445_v23  ;;  %v2720_v18 = vld [vmem:[%s5051_s1] sm:$0xff] }
0x162a   :  { %v2453_v26 = vmul.f32 1.442695, %v2450_v21  ;;  %v3978_v4 = vpack.c.bf16 %v2721_v19, %v2720_v18  ;;  %v2723_v21 = vld [vmem:[%s5051_s1 + $0x18] sm:$0xff] }
0x162b   :  { %v2451_v27 = vmul.f32 1.442695, %v2449_v24  ;;  %v3982_v23 = vpack.c.bf16 %v2723_v21, %v2722_v20  ;;  %v2830_v24 = vld [vmem:[%s5052_s2] sm:$0xff] }
0x162c   :  { %4241 = vpow2.f32 %v2453_v26  ;;  %3979 = vmatprep.subr.bf16.mxu1 %v3978_v4  ;;  %v2831_v26 = vld [vmem:[%s5052_s2 + $0x8] sm:$0xff] }
0x162d   :  { %4243 = vpow2.f32 %v2451_v27  ;;  %3981 = vmatpush3.bf16.msra.mxu1 %v3978_v4  ;;  %v3986_v27 = vpack.c.bf16 %v2831_v26, %v2830_v24  ;;  %v3363_v26 = vld [vmem:[%s5056_s0] ss:$0 sm:$0xff] }
0x162e   :  { %3983 = vmatprep.subr.bf16.mxu1 %v3982_v23 }
0x1631   :  { %3985 = vmatpush3.bf16.msra.mxu1 %v3982_v23 }
0x1636   :  { %v4242_v30 = vpop.eup %4241 }
0x1637   :  { %v4244_v29 = vpop.eup %4243  ;;  %v2458_v28 = vsel %vm501_vm7, %v4242_v30, 0.0 }
0x1638   :  { %2459 = vadd.xlane.f32.xlu1 %v2458_v28  ;;  %v2455_v31 = vsel %vm501_vm7, %v4244_v29, 0.0 }
0x1639   :  { %2456 = vadd.xlane.f32.xlu0 %v2455_v31 }
0x1649   :  { %2554 = vrot.lane.b32.xlu1 %v2135_v8, %s4370_s22 }
0x164d   :  { %2556 = vrot.lane.b32.xlu1 %v3706_v6, %s4370_s22 }
0x164f   :  { %4165 = vrot.lane.b32.xlu0 %v4824_v56, %s4368_s16 }
0x1651   :  { %2564 = vrot.lane.b32.xlu1 %v3720_v58, %s4371_s23 }
0x1653   :  { %2562 = vrot.lane.b32.xlu0 %v2339_v63, %s4371_s23 }
0x16c5   :  { %v2460_v32 = vpop.xlane.xlu1 %2459 }
0x16c6   :  { %4245 = vrcp.f32 %v2460_v32  ;;  %v2457_v33 = vpop.xlane.xlu0 %2456 }
0x16c7   :  { %4247 = vrcp.f32 %v2457_v33 }
0x16c9   :  { %v2555_v48 = vpop.permute.xlu1 %2554 }
0x16ca   :  { %v4166_v34 = vpop.permute.xlu0 %4165  ;;  %v2576_v50 = vsel %vm413_vm5, %v4870_v60, %v2555_v48  ;;  %v2836_v48 = vld [vmem:[%s5052_s2 + $0x30] sm:$0xff] }
0x16cb   :  { %v4168_v35 = vunpack.i.h.bf16 %v4166_v34  ;;  %v4167_v36 = vunpack.i.l.bf16 %v4166_v34 }
0x16cd   :  { %v3966_v38 = vpack.c.bf16 %v4168_v35, %v4167_v36  ;;  %v2557_v22 = vpop.permute.xlu1 %2556  ;;  %v3358_v35 = vld [vmem:[%s5053_s7] ss:$0 sm:$0xff] }
0x16ce   :  { %v2563_v49 = vpop.permute.xlu0 %2562  ;;  %v2577_v51 = vsel %vm413_vm5, %v4868_v59, %v2557_v22  ;;  %v2837_v22 = vld [vmem:[%s5052_s2 + $0x38] sm:$0xff] }
0x16cf   :  { %3967 = vmatprep.subr.bf16.mxu0 %v3966_v38  ;;  %v2578_v52 = vsel %vm501_vm7, %v2576_v50, %v2563_v49  ;;  %v2838_v49 = vld [vmem:[%s5052_s2 + $0x40] sm:$0xff]  ;;  %v2839_v50 = vld [vmem:[%s5052_s2 + $0x48] sm:$0xff] }
0x16d0   :  { %v4246_v40 = vpop.eup %4245  ;;  %3969 = vmatpush3.bf16.msra.mxu0 %v3966_v38  ;;  %v3359_v38 = vld [vmem:[%s5054_s10] ss:$0 sm:$0xff] }
0x16d1   :  { %v4248_v56 = vpop.eup %4247  ;;  %v2464_v42 = vmul.f32 %v4246_v40, %v4242_v30  ;;  %3971 = vmatprep.subr.bf16.mxu0 %v3970_v44  ;;  %v2565_v9 = vpop.permute.xlu1 %2564 }
0x16d2   :  { %v2463_v41 = vmul.f32 %v4248_v56, %v4244_v29  ;;  %v2579_v54 = vsel %vm501_vm7, %v2577_v51, %v2565_v9  ;;  %v3998_v9 = vpack.c.bf16 %v2837_v22, %v2836_v48  ;;  %v4002_v51 = vpack.c.bf16 %v2839_v50, %v2838_v49  ;;  %v2982_v48 = vld [vmem:[%s5057_s5 + $0x18] sm:$0xff] }
0x16d4   :  { %3732 = vmatprep.mubr.msk.f32.mxu0 %vm501_vm7, %v2463_v41 }
0x16d5   :  { %3733 = vmatmul.mubr.msk.f32.vlgmr.msra.gmra.mrb[14].mxu0 %vm501_vm7, %v2464_v42 }
0x16d6   :  { %3973 = vmatpush3.bf16.msra.mxu0 %v3970_v44  ;;  %v2833_v44 = vld [vmem:[%s5052_s2 + $0x18] sm:$0xff] }
0x16d7   :  { %3975 = vmatprep.subr.bf16.mxu0 %v3974_v7  ;;  %v3990_v45 = vpack.c.bf16 %v2833_v44, %v2832_v43  ;;  %v2979_v44 = vld [vmem:[%s5057_s5] sm:$0xff] }
0x16da   :  { %3977 = vmatpush3.bf16.msra.mxu0 %v3974_v7  ;;  %v2834_v7 = vld [vmem:[%s5052_s2 + $0x20] sm:$0xff] }
0x16db   :  { %3987 = vmatprep.subr.bf16.mxu0 %v3986_v27 }
0x17a8   :  { %v3734_v46 = vpop.f32.mrb[14].mxu0 }
0x17a9   :  { %2572 = vrot.lane.b32.xlu1 %v3734_v46, %s4372_s14  ;;  %v2543_v47 = vpop.f32.mrb[15].mxu0  ;;  %v2835_v46 = vld [vmem:[%s5052_s2 + $0x28] sm:$0xff] }
0x17aa   :  { %2570 = vrot.lane.b32.xlu0 %v2543_v47, %s4372_s14  ;;  %v3994_v47 = vpack.c.bf16 %v2835_v46, %v2834_v7  ;;  %v4373_v46 = vmov 0.0|0.0  }
0x17ab   :  { %4018 = vmatprep.subr.bf16.mxu1 %v4373_v46 }
0x181b   :  { %v2573_v25 = vpop.permute.xlu1 %2572 }
0x181c   :  { %v2571_v53 = vpop.permute.xlu0 %2570  ;;  %v2581_v57 = vsel %vm1251_vm8, %v2579_v54, %v2573_v25  ;;  %v2840_v25 = vld [vmem:[%s5052_s2 + $0x50] sm:$0xff]  ;;  %v2842_v54 = vld [vmem:[%s5052_s2 + $0x60] sm:$0xff] }
0x181d   :  { %v2580_v55 = vsel %vm1251_vm8, %v2578_v52, %v2571_v53  ;;  %v2841_v52 = vld [vmem:[%s5052_s2 + $0x58] sm:$0xff] }
0x181e   :  { %3743 = vmatprep.mubr.msk.f32.mxu0 %vm269_vm4, %v2580_v55  ;;  %v4006_v53 = vpack.c.bf16 %v2841_v52, %v2840_v25  ;;  %v2843_v55 = vld [vmem:[%s5052_s2 + $0x68] sm:$0xff] }
0x181f   :  { %3744 = vmatmul.mubr.msk.f32.vlgmr.msra.gmra.mrb[16].mxu0 %vm269_vm4, %v2581_v57  ;;  %v4010_v57 = vpack.c.bf16 %v2843_v55, %v2842_v54  ;;  %v3364_v54 = vld [vmem:[%s5058_s17] ss:$0 sm:$0xff] }
0x1820   :  { %3989 = vmatpush3.bf16.msra.mxu0 %v3986_v27 }
0x1821   :  { %3991 = vmatprep.subr.bf16.mxu0 %v3990_v45 }
0x1824   :  { %3993 = vmatpush3.bf16.msra.mxu0 %v3990_v45  ;;  %v2980_v45 = vld [vmem:[%s5057_s5 + $0x8] sm:$0xff] }
0x1825   :  { %3995 = vmatprep.subr.bf16.mxu0 %v3994_v47  ;;  %v4019_v7 = vpack.c.bf16 %v2980_v45, %v2979_v44 }
0x1828   :  { %3997 = vmatpush3.bf16.msra.mxu0 %v3994_v47  ;;  %v2981_v47 = vld [vmem:[%s5057_s5 + $0x10] sm:$0xff] }
0x1829   :  { %3999 = vmatprep.subr.bf16.mxu0 %v3998_v9  ;;  %v4022_v22 = vpack.c.bf16 %v2982_v48, %v2981_v47 }
0x182c   :  { %4001 = vmatpush3.bf16.msra.mxu0 %v3998_v9 }
0x182d   :  { %4003 = vmatprep.subr.bf16.mxu0 %v4002_v51 }
0x1830   :  { %4005 = vmatpush3.bf16.msra.mxu0 %v4002_v51 }
0x1831   :  { %4007 = vmatprep.subr.bf16.mxu0 %v4006_v53 }
0x1834   :  { %4009 = vmatpush3.bf16.msra.mxu0 %v4006_v53 }
0x1835   :  { %4011 = vmatprep.subr.bf16.mxu0 %v4010_v57 }
0x1838   :  { %4013 = vmatpush3.bf16.msra.mxu0 %v4010_v57 }
0x18f2   :  { %v3745_v62 = vpop.f32.mrb[16].mxu0 }
0x18f3   :  { %v2671_v60 = vadd.f32 %v3745_v62, %v3355_v61  ;;  %v2665_v1 = vpop.f32.mrb[17].mxu0  ;;  %v2845_v62 = vld [vmem:[%s5052_s2 + $0x78] sm:$0xff] }
0x18f4   :  { %v2666_v5 = vadd.f32 %v3355_v61, %v2665_v1  ;;  %v2844_v61 = vld [vmem:[%s5052_s2 + $0x70] sm:$0xff]  ;;  %v3360_v1 = vld [vmem:[%s5055_s11] ss:$0 sm:$0xff] }
0x18f5   :  { %v2675_v59 = vadd.f32 %v2671_v60, %v4809_v3  ;;  %v4014_v60 = vpack.c.bf16 %v2845_v62, %v2844_v61  ;;  %v3365_v62 = vld [vmem:[%s5059_s21] ss:$0 sm:$0xff] }
0x18f6   :  { %v2674_v6 = vadd.f32 %v2666_v5, %v4807_v2 }
0x18f7   :  { %v2681_v8 = vsel %vm269_vm4, %v2675_v59, 0.0  ;;  %4015 = vmatprep.subr.bf16.mxu0 %v4014_v60 }
0x18f8   :  { %2682 = vadd.xlane.f32.xlu1 %v2681_v8  ;;  %v2678_v58 = vsel %vm269_vm4, %v2674_v6, 0.0  ;;  %4017 = vmatpush3.bf16.msra.mxu0 %v4014_v60 }
0x18f9   :  { %2679 = vadd.xlane.f32.xlu0 %v2678_v58 }
0x1985   :  { %v2683_v63 = vpop.xlane.xlu1 %2682 }
0x1986   :  { %v2685_v10 = vmul.f32 0.03125, %v2683_v63  ;;  %v2680_v11 = vpop.xlane.xlu0 %2679 }
0x1987   :  { %v2684_v12 = vmul.f32 0.03125, %v2680_v11 }
0x1988   :  { %v2687_v0 = vsub.f32 %v2675_v59, %v2685_v10 }
0x1989   :  { %v2686_v13 = vsub.f32 %v2674_v6, %v2684_v12 }
0x198a   :  { %v2689_v3 = vmul.f32 %v2687_v0, %v2687_v0 }
0x198b   :  { %v2688_v15 = vmul.f32 %v2686_v13, %v2686_v13 }
0x198c   :  { %v2693_v17 = vsel %vm269_vm4, %v2689_v3, 0.0 }
0x198d   :  { %v2690_v2 = vsel %vm269_vm4, %v2688_v15, 0.0 }
0x198e   :  { %2691 = vadd.xlane.f32.xlu0 %v2690_v2 }
0x1992   :  { %2694 = vadd.xlane.f32.xlu0 %v2693_v17 }
0x1a1b   :  { %v2692_v30 = vpop.xlane.xlu0 %2691 }
0x1a1c   :  { %v2696_v29 = vmul.f32 0.03125, %v2692_v30 }
0x1a1e   :  { %v2698_v28 = vadd.f32 1e-05, %v2696_v29 }
0x1a1f   :  { %v2695_v31 = vpop.xlane.xlu0 %2694 }
0x1a20   :  { %4249 = vrsqrt.f32 %v2698_v28  ;;  %v2697_v32 = vmul.f32 0.03125, %v2695_v31 }
0x1a22   :  { %v2699_v33 = vadd.f32 1e-05, %v2697_v32 }
0x1a24   :  { %4251 = vrsqrt.f32 %v2699_v33 }
0x1a2a   :  { %v4250_v34 = vpop.eup %4249 }
0x1a2b   :  { %v2702_v36 = vmul.f32 %v4250_v34, %v2686_v13 }
0x1a2d   :  { %v2710_v40 = vmul.f32 %v3358_v35, %v2702_v36 }
0x1a2e   :  { %v4252_v56 = vpop.eup %4251 }
0x1a2f   :  { %v2703_v41 = vmul.f32 %v4252_v56, %v2687_v0  ;;  %v4949_v42 = vadd.f32 %v3359_v38, %v2710_v40 }
0x1a31   :  { %v2711_v39 = vmul.f32 %v3358_v35, %v2703_v41  ;;  %3754 = vmatprep.mubr.msk.f32.mxu1 %vm269_vm4, %v4949_v42 }
0x1a33   :  { %v4953_v37 = vadd.f32 %v3359_v38, %v2711_v39 }
0x1a35   :  { %3755 = vmatmul.mubr.msk.f32.vlgmr.msra.gmra.mrb[28].mxu1 %vm269_vm4, %v4953_v37 }
0x1a36   :  { %4020 = vmatpush3.bf16.msra.mxu1 %v4019_v7  ;;  %3800 = vmatprep.mubr.msk.f32.mxu1 %vm4374_vm9, %v4358_v16 }
0x1a37   :  { %4021 = vmatprep.subr.bf16.mxu1 %v4373_v46 }
0x1a3a   :  { %4023 = vmatpush3.bf16.msra.mxu1 %v4022_v22 }
0x1a3b   :  { %4024 = vmatprep.subr.bf16.mxu1 %v4373_v46 }
0x1b08   :  { %v3756_v5 = vpop.f32.mrb[28].mxu1 }
0x1b09   :  { %v2809_v59 = vadd.f32 %v3756_v5, %v3360_v1  ;;  %v2803_v6 = vpop.f32.mrb[29].mxu1 }
0x1b0a   :  { %v2804_v8 = vadd.f32 %v3360_v1, %v2803_v6 }
0x1b0b   :  { %v2815_v58 = vmul.f32 0.044715, %v2809_v59  ;;  %v2813_v21 = vmul.f32 0.5, %v2809_v59 }
0x1b0c   :  { %v2814_v63 = vmul.f32 0.044715, %v2804_v8  ;;  %v2812_v4 = vmul.f32 0.5, %v2804_v8 }
0x1b0d   :  { %v2817_v10 = vmul.f32 %v2815_v58, %v2809_v59  ;;  %v3366_v58 = vld [vmem:[%s5060_s25] ss:$0 sm:$0xff] }
0x1b0e   :  { %v2816_v11 = vmul.f32 %v2814_v63, %v2804_v8 }
0x1b0f   :  { %v2819_v12 = vmul.f32 %v2817_v10, %v2809_v59 }
0x1b10   :  { %v2818_v0 = vmul.f32 %v2816_v11, %v2804_v8 }
0x1b11   :  { %v2821_v13 = vadd.f32 %v2819_v12, %v2809_v59 }
0x1b12   :  { %v2820_v15 = vadd.f32 %v2818_v0, %v2804_v8 }
0x1b13   :  { %v2823_v2 = vmul.f32 0.7978846, %v2821_v13 }
0x1b14   :  { %v2822_v3 = vmul.f32 0.7978846, %v2820_v15 }
0x1b15   :  { %4253 = vtanh.f32 %v2823_v2 }
0x1b16   :  { %4255 = vtanh.f32 %v2822_v3 }
0x1b1f   :  { %v4254_v17 = vpop.eup %4253 }
0x1b20   :  { %v4256_v18 = vpop.eup %4255  ;;  %v2827_v19 = vadd.f32 1.0, %v4254_v17  ;;  %v3188_v17 = vld [vmem:[%s5061_s29] sm:$0x3] }
0x1b21   :  { %v2826_v20 = vadd.f32 1.0, %v4256_v18  ;;  %v3103_v18 = vld [vmem:[%s4560_s12 + $0x8] sm:$0xff] }
0x1b22   :  { %v2829_v24 = vmul.f32 %v2827_v19, %v2813_v21  ;;  %v3104_v19 = vld [vmem:[%s4560_s12 + $0x10] sm:$0xff] }
0x1b23   :  { %v2828_v23 = vmul.f32 %v2826_v20, %v2812_v4  ;;  %v3105_v20 = vld [vmem:[%s4560_s12 + $0x18] sm:$0xff] }
0x1b24   :  { %v4028_v21 = vpack.c.bf16 %v3105_v20, %v3104_v19 }
0x1b25   :  { %3789 = vmatprep.mubr.f32.mxu0 %v2828_v23 }
0x1b26   :  { %3790 = vmatmul.mubr.f32.vlgmr.msra.gmra.mrb[18].mxu0 %v2829_v24 }
0x1bf9   :  { %v3791_v27 = vpop.f32.mrb[18].mxu0 }
0x1bfa   :  { %v2925_v30 = vadd.f32 %v3791_v27, %v3363_v26  ;;  %v2919_v29 = vpop.f32.mrb[19].mxu0 }
0x1bfb   :  { %v2920_v28 = vadd.f32 %v3363_v26, %v2919_v29 }
0x1bfc   :  { %v2929_v31 = vadd.f32 %v2925_v30, %v4953_v37  ;;  %v3368_v30 = vld [vmem:[%s5062_s3] ss:$0 sm:$0xff] }
0x1bfd   :  { %v2928_v32 = vadd.f32 %v2920_v28, %v4949_v42  ;;  %v3369_v28 = vld [vmem:[%s5063_s8] ss:$0 sm:$0xff] }
0x1bfe   :  { %v2935_v33 = vsel %vm269_vm4, %v2929_v31, 0.0 }
0x1bff   :  { %2936 = vadd.xlane.f32.xlu1 %v2935_v33  ;;  %v2932_v34 = vsel %vm269_vm4, %v2928_v32, 0.0 }
0x1c00   :  { %2933 = vadd.xlane.f32.xlu0 %v2932_v34 }
0x1c8c   :  { %v2937_v35 = vpop.xlane.xlu1 %2936 }
0x1c8d   :  { %v2939_v36 = vmul.f32 0.03125, %v2937_v35  ;;  %v2934_v38 = vpop.xlane.xlu0 %2933 }
0x1c8e   :  { %v2938_v40 = vmul.f32 0.03125, %v2934_v38 }
0x1c8f   :  { %v2941_v56 = vsub.f32 %v2929_v31, %v2939_v36 }
0x1c90   :  { %v2940_v41 = vsub.f32 %v2928_v32, %v2938_v40 }
0x1c91   :  { %v2943_v39 = vmul.f32 %v2941_v56, %v2941_v56 }
0x1c92   :  { %v2942_v37 = vmul.f32 %v2940_v41, %v2940_v41 }
0x1c93   :  { %v2947_v42 = vsel %vm269_vm4, %v2943_v39, 0.0 }
0x1c94   :  { %2948 = vadd.xlane.f32.xlu1 %v2947_v42  ;;  %v2944_v43 = vsel %vm269_vm4, %v2942_v37, 0.0  ;;  %v3370_v37 = vld [vmem:[%s4565_s27] ss:$0 sm:$0xff] }
0x1c95   :  { %2945 = vadd.xlane.f32.xlu0 %v2944_v43 }
0x1d21   :  { %v2949_v9 = vpop.xlane.xlu1 %2948 }
0x1d22   :  { %v2951_v49 = vmul.f32 0.03125, %v2949_v9  ;;  %v2946_v50 = vpop.xlane.xlu0 %2945 }
0x1d23   :  { %v2950_v25 = vmul.f32 0.03125, %v2946_v50 }
0x1d24   :  { %v2953_v51 = vadd.f32 1e-05, %v2951_v49 }
0x1d25   :  { %v2952_v52 = vadd.f32 1e-05, %v2950_v25 }
0x1d26   :  { %4257 = vrsqrt.f32 %v2953_v51 }
0x1d27   :  { %4259 = vrsqrt.f32 %v2952_v52 }
0x1d30   :  { %v4258_v53 = vpop.eup %4257 }
0x1d31   :  { %v4260_v55 = vpop.eup %4259  ;;  %v2957_v57 = vmul.f32 %v4258_v53, %v2941_v56 }
0x1d32   :  { %v2956_v61 = vmul.f32 %v4260_v55, %v2940_v41 }
0x1d33   :  { %v2965_v60 = vmul.f32 %v3364_v54, %v2957_v57 }
0x1d34   :  { %v2964_v1 = vmul.f32 %v3364_v54, %v2956_v61 }
0x1d35   :  { %v2973_v5 = vadd.f32 %v3365_v62, %v2965_v60 }
0x1d36   :  { %v2972_v59 = vadd.f32 %v3365_v62, %v2964_v1 }
0x1d37   :  { %v2975_v6 = vrot.slane %v2973_v5, 7 }
0x1d39   :  { %v2978_v8 = vsel %vm2977_vm10, %v2972_v59, %v2975_v6 }
0x1d3a   :  { %3801 = vmatmul.mubr.msk.f32.vlgmr.msra.gmra.mrb[30].mxu1 %vm269_vm4, %v2978_v8 }
0x1d3b   :  { %3811 = vmatprep.mubr.msk.f32.mxu1 %vm4374_vm9, %v4358_v16  ;;  %v3102_v16 = vld [vmem:[%s4560_s12] sm:$0xff]  ;;  %s4375_s12 = smov [#allocation2]  }
0x1d3c   :  { %v4025_v4 = vpack.c.bf16 %v3103_v18, %v3102_v16  ;;  %s3225_s27 = sshll.u32 %s4375_s12, 4  ;;  %s3226_s27 = int_to_ptr.vmem [resolvable:$true] %s3225_s27 }
0x1d3d   :  { %s4271_s15 = scalar_lea.vmem %s3226_s27, 32  ;;  %p4276_p1 = scmp.lt.s32.totalorder %s3226_s27, %s3226_s27 }
0x1d3e   :  { %4026 = vmatpush3.bf16.msra.mxu1 %v4025_v4  ;;  %p4272_p0 = scmp.ne.s32.totalorder %s3226_s27, %s4271_s15  ;;  %p4277_p2 = scmp.lt.s32.totalorder %s4271_s15, %s4271_s15 }
0x1d3f   :  { %4027 = vmatprep.subr.bf16.mxu1 %v4373_v46 }
0x1d40   :  { %p4278_p3 = por %p4277_p2, %p4276_p1 }
0x1d42   :  { %4029 = vmatpush3.bf16.msra.mxu1 %v4028_v21  ;;  %p4279_p4 = pnand %p4278_p3, %p4272_p0 }
0x1e0d   :  { %v3059_v63 = vpop.f32.mrb[30].mxu1 }
0x1e0e   :  { %v3060_v10 = vadd.f32 %v3366_v58, %v3059_v63  ;;  %v3802_v11 = vpop.f32.mrb[31].mxu1 }
0x1e10   :  { %v3066_v12 = vsel %vm3065_vm11, %v3060_v10, 0.0 }
0x1e11   :  { %3067 = vadd.xlane.f32.xlu1 %v3066_v12 }
0x1e9e   :  { %v3068_v0 = vpop.xlane.xlu1 %3067 }
0x1e9f   :  { %v3069_v13 = vmul.f32 0.03125, %v3068_v0 }
0x1ea1   :  { %v3070_v15 = vsub.f32 %v3060_v10, %v3069_v13 }
0x1ea3   :  { %v3071_v2 = vmul.f32 %v3070_v15, %v3070_v15 }
0x1ea5   :  { %v3072_v3 = vsel %vm3065_vm11, %v3071_v2, 0.0 }
0x1ea6   :  { %3073 = vadd.xlane.f32.xlu0 %v3072_v3 }
0x1ebc   :  { %3201 = vperm.xlu0 %4088, %v3188_v17  }
0x1f33   :  { %v3074_v23 = vpop.xlane.xlu0 %3073 }
0x1f34   :  { %v3075_v24 = vmul.f32 0.03125, %v3074_v23 }
0x1f36   :  { %v3076_v26 = vadd.f32 1e-05, %v3075_v24 }
0x1f38   :  { %4261 = vrsqrt.f32 %v3076_v26 }
0x1f3b   :  { %v3202_v48 = vpop.permute.xlu0 %3201 }
0x1f3c   :  { %vm3203_vm13 = vcmp.eq.s32.totalorder %v4588_v14, %v3202_v48 }
0x1f42   :  { %v4262_v27 = vpop.eup %4261 }
0x1f43   :  { %v3078_v29 = vmul.f32 %v4262_v27, %v3070_v15 }
0x1f45   :  { %v3085_v31 = vmul.f32 %v3368_v30, %v3078_v29 }
0x1f47   :  { %v3092_v32 = vadd.f32 %v3369_v28, %v3085_v31 }
0x1f49   :  { %v3094_v33 = vmul.f32 0.044715, %v3092_v32  ;;  %v3093_v56 = vmul.f32 0.5, %v3092_v32 }
0x1f4b   :  { %v3095_v34 = vmul.f32 %v3094_v33, %v3092_v32 }
0x1f4d   :  { %v3096_v35 = vmul.f32 %v3095_v34, %v3092_v32 }
0x1f4f   :  { %v3097_v36 = vadd.f32 %v3096_v35, %v3092_v32 }
0x1f51   :  { %v3098_v38 = vmul.f32 0.7978846, %v3097_v36 }
0x1f53   :  { %4263 = vtanh.f32 %v3098_v38 }
0x1f5d   :  { %v4264_v40 = vpop.eup %4263 }
0x1f5e   :  { %v3100_v41 = vadd.f32 1.0, %v4264_v40 }
0x1f60   :  { %v3101_v39 = vmul.f32 %v3100_v41, %v3093_v56 }
0x1f62   :  { %3812 = vmatmul.mubr.msk.f32.vlgmr.msra.gmra.mrb[32].mxu1 %vm269_vm4, %v3101_v39 }
0x2035   :  { %v3182_v42 = vpop.f32.mrb[32].mxu1 }
0x2036   :  { %v3183_v43 = vadd.f32 %v3370_v37, %v3182_v42  ;;  %v3813_v44 = vpop.f32.mrb[33].mxu1 }
0x2038   :  { %v3189_v45 = vsel %vm3186_vm12, %v3183_v43, -inf  ;;  %3187 = vst.msk [vmem:[#allocation2] sm:$0x3] %vm3186_vm12, %v3183_v43 }
0x2039   :  { %3190 = vmax.xlane.f32.xlu1 %v3189_v45 }
0x20c6   :  { %v3191_v7 = vpop.xlane.xlu1 %3190 }
0x20c7   :  { %v3192_v46 = vsub.f32 %v3183_v43, %v3191_v7 }
0x20c9   :  { %v3193_v47 = vmul.f32 1.442695, %v3192_v46  ;;  %v3204_v49 = vsel %vm3203_vm13, %v3192_v46, 0.0 }
0x20ca   :  { %v3205_v50 = vsel %vm3186_vm12, %v3204_v49, 0.0 }
0x20cb   :  { %4265 = vpow2.f32 %v3193_v47 }
0x20d5   :  { %v4266_v22 = vpop.eup %4265 }
0x20d6   :  { %v3195_v9 = vsel %vm3186_vm12, %v4266_v22, 0.0 }
0x20d7   :  { %3196 = vadd.xlane.f32.xlu1 %v3195_v9 }
0x20db   :  { %3206 = vadd.xlane.f32.xlu1 %v3205_v50 }
0x20dc   :  { %4282 = shalt.err (!%p4279_p4)
}
0x20dd   :  { %s4283_s16 = scalar_lea.hbm %s4570_s4, 32 }
0x20de   :  { %p4284_p5 = scmp.ne.s32.totalorder %s4570_s4, %s4283_s16  ;;  %p4287_p6 = scmp.lt.u32.totalorder %s4283_s16, %s4570_s4 }
0x20e0   :  { %p4289_p7 = pnand %p4287_p6, %p4284_p5 }
0x20e2   :  { %4292 = shalt.err (!%p4289_p7)
}
0x20e3   :  { %3228 = dma.vmem_to_hbm [thread:$0]  %s3226_s27, 32, %s4570_s4, [#allocation3]   ;;  %vm3217_vm14 = vcmask 0  }
0x20e4   :  { %s4376_s18 = smov [#allocation4]  }
0x20e5   :  { %s3235_s22 = sshll.u32 %s4376_s18, 4  ;;  %s3236_s22 = int_to_ptr.vmem [resolvable:$true] %s3235_s22 }
0x20e6   :  { %s4293_s4 = scalar_lea.vmem %s3236_s22, 16  ;;  %s4297_s23 = scalar_lea.vmem %s3236_s22, 32 }
0x20e7   :  { %p4294_p8 = scmp.ne.s32.totalorder %s3236_s22, %s4293_s4  ;;  %p4298_p9 = scmp.lt.s32.totalorder %s3236_s22, %s3236_s22 }
0x20e8   :  { %p4299_p10 = scmp.lt.s32.totalorder %s4297_s23, %s4293_s4 }
0x20ea   :  { %p4300_p11 = por %p4299_p10, %p4298_p9 }
0x20ec   :  { %p4301_p12 = pnand %p4300_p11, %p4294_p8 }
0x2164   :  { %v3197_v14 = vpop.xlane.xlu1 %3196 }
0x2165   :  { %4267 = vlog2.f32 %v3197_v14 }
0x2168   :  { %v3207_v52 = vpop.xlane.xlu1 %3206 }
0x216f   :  { %v4268_v25 = vpop.eup %4267 }
0x2170   :  { %v3199_v51 = vmul.f32 0.6931472, %v4268_v25 }
0x2172   :  { %v3208_v53 = vsub.f32 %v3199_v51, %v3207_v52 }
0x2174   :  { %v3209_v54 = vsel %vm188_vm0, %v3208_v53, 0.0 }
0x2175   :  { %v3210_v55 = vrot.slane %v3209_v54, 4 }
0x2177   :  { %v3211_v57 = vadd.f32 %v3210_v55, %v3209_v54 }
0x2179   :  { %v3212_v61 = vrot.slane %v3211_v57, 2 }
0x217b   :  { %v3213_v62 = vadd.f32 %v3212_v61, %v3211_v57 }
0x217d   :  { %v3214_v60 = vrot.slane %v3213_v62, 1 }
0x217f   :  { %v3215_v1 = vadd.f32 %v3214_v60, %v3213_v62 }
0x2181   :  { %v3216_v5 = vmul.f32 0.5, %v3215_v1 }
0x2183   :  { %3218 = vst.msk [vmem:[#allocation4] sm:$0x1] %vm3217_vm14, %v3216_v5 }
0x2184   :  { %4304 = shalt.err (!%p4301_p12)
}
0x2185   :  { %s4305_s14 = scalar_lea.hbm %s4575_s13, 16 }
0x2186   :  { %p4306_p13 = scmp.ne.s32.totalorder %s4575_s13, %s4305_s14  ;;  %p4309_p0 = scmp.lt.u32.totalorder %s4305_s14, %s4575_s13 }
0x2188   :  { %p4311_p1 = pnand %p4309_p0, %p4306_p13 }
0x218a   :  { %4314 = shalt.err (!%p4311_p1)
}
0x218b   :  { %3238 = dma.vmem_to_hbm [thread:$0]  %s3236_s22, 16, %s4575_s13, [#allocation5]  }
0x218c   :  { %4315 = dma.done.wait [#allocation3], 32  }
0x218d   :  { %4316 = vsyncadd [#allocation3], 4294967264 }
0x218e   :  { %4317 = dma.done.wait [#allocation5], 16  }
0x218f   :  { %4318 = vsyncadd [#allocation5], 4294967280 }
0x2190   :  { %3245 = vsyncpa [#allocation3], 1 }
0x2191   :  { %3246 = vsyncpa [#allocation5], 1 }

</bundles_post_ra>
